<compile_context>
chip_gen: v7x
topology: tpu7x:2x2x1
jax: 0.10.0
libtpu: 0.0.40
codegen_flags: <defaults>
</compile_context>

<pallas_src>
import functools

import jax
import jax.numpy as jnp
from jax.experimental import pallas as pl
from jax.experimental.pallas import tpu as pltpu

BN_EPS = 1e-5
LANE = 128


def _round_up(n, m):
    return ((n + m - 1) // m) * m


def _bf16_valu():
    """v6e/v7x VALUs are bf16-capable; keep the fp32 epilogue on v5e & older."""
    try:
        kind = jax.devices()[0].device_kind.lower()
        return not any(tag in kind for tag in ("v2", "v3", "v4", "v5"))
    except Exception:
        return True


def mlp_kernel(x_ref,
               w1_ref, t1_ref,
               w2_ref, t2_ref,
               w3_ref, t3_ref,
               w4_ref, b4_ref,
               o_ref, *, bf16_epilogue):
    """Fused MLP forward for one batch tile.

    Weights already have the BN scale folded in and are lane-padded bf16;
    t*_ref / b4_ref are fp32 (1, D) per-feature shifts (linear bias + BN
    shift folded, zero in padded columns).
    """
    def act(h_f32, t_ref):
        h = h_f32 + t_ref[...]                       # shift-add stays fp32
        if bf16_epilogue:
            # bf16 ReLU: half the vregs on bf16-capable VALUs (v6e/v7x).
            return jnp.maximum(h.astype(jnp.bfloat16), 0)
        return jnp.maximum(h, 0.0).astype(jnp.bfloat16)

    x = x_ref[...].astype(jnp.bfloat16)
    h = act(jnp.dot(x, w1_ref[...], preferred_element_type=jnp.float32), t1_ref)
    h = act(jnp.dot(h, w2_ref[...], preferred_element_type=jnp.float32), t2_ref)
    h = act(jnp.dot(h, w3_ref[...], preferred_element_type=jnp.float32), t3_ref)
    h = jnp.dot(h, w4_ref[...], preferred_element_type=jnp.float32) + b4_ref[...]
    o_ref[...] = h.astype(o_ref.dtype)


def make_params(key, features, num_classes):
    """Synthetic parameters mirroring Net.__init__ shapes.

    BN (inference) is folded into the weights, and every hidden/output width
    is zero-padded to a multiple of 128 lanes — both transforms are exact.
    """
    dims = [features, 300, 200, 100, num_classes]
    dims_pad = [features] + [_round_up(d, LANE) for d in dims[1:]]  # 384/256/128/128
    params = []
    for li in range(4):
        d_in, d_out = dims[li], dims[li + 1]
        p_in, p_out = dims_pad[li], dims_pad[li + 1]
        key, kw, kb, kg, kbe, km, kv = jax.random.split(key, 7)
        # nn.Linear stores (out, in); we keep (in, out) so the kernel does x @ W.
        bound = 1.0 / jnp.sqrt(d_in)
        W = jax.random.uniform(kw, (d_in, d_out), jnp.float32, -bound, bound)
        b = jax.random.uniform(kb, (d_out,), jnp.float32, -bound, bound)
        if li < 3:
            gamma = jax.random.uniform(kg, (d_out,), jnp.float32, 0.5, 1.5)
            beta = jax.random.uniform(kbe, (d_out,), jnp.float32, -0.5, 0.5)
            r_mean = jax.random.uniform(km, (d_out,), jnp.float32, -0.5, 0.5)
            r_var = jax.random.uniform(kv, (d_out,), jnp.float32, 0.5, 1.5)
            scale = gamma / jnp.sqrt(r_var + BN_EPS)
            W_fold = W * scale[None, :]               # exact BN-scale fold
            shift = (b - r_mean) * scale + beta       # bias + BN shift fold
        else:
            W_fold, shift = W, b                      # final layer: no BN
        # Lane-pad: zero output columns (relu(0+0)=0; padded logits sliced off)
        # and zero input rows (padded hidden units are exactly zero).
        W_fold = jnp.pad(W_fold, ((0, p_in - d_in), (0, p_out - d_out)))
        shift = jnp.pad(shift, ((0, p_out - d_out),))
        params.append((W_fold.astype(jnp.bfloat16),
                       shift.astype(jnp.float32).reshape(1, -1)))
    return params


def net_forward(x, params, num_classes, *, tm=1024, out_dtype=jnp.float32):
    (w1, t1), (w2, t2), (w3, t3), (w4, b4) = params
    B, F = x.shape
    n_out = w4.shape[1]                     # lane-padded class width (128)

    # Batch tile: large (amortize per-step overhead) but capped so the grid
    # has >=2 steps when B allows it (both TensorCores get work on v7x).
    TM = min(tm, _round_up(B, 8))
    TM = max(8, min(TM, _round_up(pl.cdiv(B, 2), 8)))
    B_pad = _round_up(B, TM)
    if B_pad != B:
        x = jnp.pad(x, ((0, B_pad - B), (0, 0)))
    grid = (B_pad // TM,)

    d1, d2, d3 = w1.shape[1], w2.shape[1], w3.shape[1]
    flops = 2 * B_pad * (F * d1 + d1 * d2 + d2 * d3 + d3 * n_out)
    bytes_accessed = int(B_pad * F * x.dtype.itemsize
                         + sum(int(a.size) * a.dtype.itemsize
                               for a in (w1, t1, w2, t2, w3, t3, w4, b4))
                         + B_pad * n_out * jnp.dtype(out_dtype).itemsize)

    kernel = functools.partial(mlp_kernel, bf16_epilogue=_bf16_valu())

    def _pallas_forward(single_buffer_weights):
        # Weights/shifts never change across grid steps; one VMEM buffer is
        # enough (skips redundant double-buffer bookkeeping / ~0.3 MiB VMEM).
        res_kw = ({"pipeline_mode": pl.Buffered(1)}
                  if single_buffer_weights else {})

        def resident(a):
            return pl.BlockSpec(a.shape, lambda i: (0, 0), **res_kw)

        return pl.pallas_call(
            kernel,
            out_shape=jax.ShapeDtypeStruct((B_pad, n_out), out_dtype),
            grid=grid,
            in_specs=[pl.BlockSpec((TM, F), lambda i: (i, 0)),
                      resident(w1), resident(t1),
                      resident(w2), resident(t2),
                      resident(w3), resident(t3),
                      resident(w4), resident(b4)],
            out_specs=pl.BlockSpec((TM, n_out), lambda i: (i, 0)),
            compiler_params=pltpu.CompilerParams(
                dimension_semantics=("parallel",)),
            cost_estimate=pl.CostEstimate(flops=flops,
                                          transcendentals=0,
                                          bytes_accessed=bytes_accessed),
        )(x, w1, t1, w2, t2, w3, t3, w4, b4)

    try:
        out = _pallas_forward(True)
    except Exception:
        # pipeline_mode=pl.Buffered(1) not accepted by this JAX build; fall
        # back to default double-buffering (correctness unaffected).
        out = _pallas_forward(False)

    # NOTE: if the consumer can accept the lane-padded (B_pad, 128) logits
    # buffer directly (or bf16 logits via out_dtype), skip this slice to avoid
    # an extra pass over B x 128 in XLA.
    return out[:B, :num_classes]


def net_forward_ref(x, params, num_classes):
    """Pure-JAX reference mirroring the kernel's precision policy."""
    (w1, t1), (w2, t2), (w3, t3), (w4, b4) = params

    def stage(h, w, t):
        z = jnp.dot(h.astype(jnp.bfloat16), w,
                    preferred_element_type=jnp.float32) + t
        return jnp.maximum(z, 0.0)

    h = stage(x, w1, t1)
    h = stage(h, w2, t2)
    h = stage(h, w3, t3)
    out = jnp.dot(h.astype(jnp.bfloat16), w4,
                  preferred_element_type=jnp.float32) + b4
    return out[:, :num_classes]


if __name__ == "__main__":
    key = jax.random.PRNGKey(0)
    k_x, k_p = jax.random.split(key)

    # Small, deterministic example: exercises batch padding, >=2 grid steps,
    # and the final class-slice.
    batch, features, num_classes = 37, 32, 10
    x = jax.random.normal(k_x, (batch, features), jnp.float32)
    params = make_params(k_p, features, num_classes)

    out = jax.block_until_ready(net_forward(x, params, num_classes))
    ref = net_forward_ref(x, params, num_classes)

    assert out.shape == (batch, num_classes)
    assert jnp.allclose(out, ref.astype(out.dtype), atol=2e-2, rtol=2e-2), \
        "mismatch vs reference"

    print("KERNEL_OK")
</pallas_src>

<mosaic_0001>
module attributes {stable_mosaic.version = 11 : i64} {
  func.func @mlp_kernel(%arg0: i32, %arg1: memref<24x32xf32, #tpu.memory_space<vmem>>, %arg2: memref<32x384xbf16, #tpu.memory_space<vmem>>, %arg3: memref<1x384xf32, #tpu.memory_space<vmem>>, %arg4: memref<384x256xbf16, #tpu.memory_space<vmem>>, %arg5: memref<1x256xf32, #tpu.memory_space<vmem>>, %arg6: memref<256x128xbf16, #tpu.memory_space<vmem>>, %arg7: memref<1x128xf32, #tpu.memory_space<vmem>>, %arg8: memref<128x128xbf16, #tpu.memory_space<vmem>>, %arg9: memref<1x128xf32, #tpu.memory_space<vmem>>, %arg10: memref<24x128xf32, #tpu.memory_space<vmem>>) attributes {dimension_semantics = [#tpu.dimension_semantics<parallel>], iteration_bounds = array<i64: 2>, scalar_prefetch = 0 : i64, scratch_operands = 0 : i64, tpu.core_type = #tpu.core_type<tc>, window_params = [{transform_indices = @transform_0, window_bounds = array<i64: 24, 32>}, {pipeline_mode = #tpu.pipeline_mode<synchronous>, transform_indices = @transform_1, window_bounds = array<i64: 32, 384>}, {pipeline_mode = #tpu.pipeline_mode<synchronous>, transform_indices = @transform_2, window_bounds = array<i64: 1, 384>}, {pipeline_mode = #tpu.pipeline_mode<synchronous>, transform_indices = @transform_3, window_bounds = array<i64: 384, 256>}, {pipeline_mode = #tpu.pipeline_mode<synchronous>, transform_indices = @transform_4, window_bounds = array<i64: 1, 256>}, {pipeline_mode = #tpu.pipeline_mode<synchronous>, transform_indices = @transform_5, window_bounds = array<i64: 256, 128>}, {pipeline_mode = #tpu.pipeline_mode<synchronous>, transform_indices = @transform_6, window_bounds = array<i64: 1, 128>}, {pipeline_mode = #tpu.pipeline_mode<synchronous>, transform_indices = @transform_7, window_bounds = array<i64: 128, 128>}, {pipeline_mode = #tpu.pipeline_mode<synchronous>, transform_indices = @transform_8, window_bounds = array<i64: 1, 128>}, {transform_indices = @transform_9, window_bounds = array<i64: 24, 128>}]} {
    %c0 = arith.constant 0 : index
    %c0_0 = arith.constant 0 : index
    %0 = vector.load %arg1[%c0, %c0_0] : memref<24x32xf32, #tpu.memory_space<vmem>>, vector<24x32xf32>
    %1 = arith.truncf %0 : vector<24x32xf32> to vector<24x32xbf16>
    %c0_1 = arith.constant 0 : index
    %c0_2 = arith.constant 0 : index
    %2 = vector.load %arg2[%c0_1, %c0_2] : memref<32x384xbf16, #tpu.memory_space<vmem>>, vector<32x384xbf16>
    %cst = arith.constant dense<0.000000e+00> : vector<24x384xf32>
    %3 = tpu.matmul %1, %2, %cst {dimension_numbers = #tpu.dot_dimension_numbers<[1], [0], [0], [1], [0, 0, 1, 1], [], []>} : vector<24x32xbf16>, vector<32x384xbf16>, vector<24x384xf32> -> vector<24x384xf32>
    %c0_3 = arith.constant 0 : index
    %c0_4 = arith.constant 0 : index
    %4 = vector.load %arg3[%c0_3, %c0_4] : memref<1x384xf32, #tpu.memory_space<vmem>>, vector<1x384xf32>
    %5 = vector.broadcast %4 : vector<1x384xf32> to vector<24x384xf32>
    %6 = arith.addf %3, %5 : vector<24x384xf32>
    %7 = arith.truncf %6 : vector<24x384xf32> to vector<24x384xbf16>
    %cst_5 = arith.constant 0.000000e+00 : bf16
    %8 = vector.broadcast %cst_5 : bf16 to vector<24x384xbf16>
    %9 = arith.maximumf %7, %8 : vector<24x384xbf16>
    %c0_6 = arith.constant 0 : index
    %c0_7 = arith.constant 0 : index
    %10 = vector.load %arg4[%c0_6, %c0_7] : memref<384x256xbf16, #tpu.memory_space<vmem>>, vector<384x256xbf16>
    %cst_8 = arith.constant dense<0.000000e+00> : vector<24x256xf32>
    %11 = tpu.matmul %9, %10, %cst_8 {dimension_numbers = #tpu.dot_dimension_numbers<[1], [0], [0], [1], [0, 0, 1, 1], [], []>} : vector<24x384xbf16>, vector<384x256xbf16>, vector<24x256xf32> -> vector<24x256xf32>
    %c0_9 = arith.constant 0 : index
    %c0_10 = arith.constant 0 : index
    %12 = vector.load %arg5[%c0_9, %c0_10] : memref<1x256xf32, #tpu.memory_space<vmem>>, vector<1x256xf32>
    %13 = vector.broadcast %12 : vector<1x256xf32> to vector<24x256xf32>
    %14 = arith.addf %11, %13 : vector<24x256xf32>
    %15 = arith.truncf %14 : vector<24x256xf32> to vector<24x256xbf16>
    %cst_11 = arith.constant 0.000000e+00 : bf16
    %16 = vector.broadcast %cst_11 : bf16 to vector<24x256xbf16>
    %17 = arith.maximumf %15, %16 : vector<24x256xbf16>
    %c0_12 = arith.constant 0 : index
    %c0_13 = arith.constant 0 : index
    %18 = vector.load %arg6[%c0_12, %c0_13] : memref<256x128xbf16, #tpu.memory_space<vmem>>, vector<256x128xbf16>
    %cst_14 = arith.constant dense<0.000000e+00> : vector<24x128xf32>
    %19 = tpu.matmul %17, %18, %cst_14 {dimension_numbers = #tpu.dot_dimension_numbers<[1], [0], [0], [1], [0, 0, 1, 1], [], []>} : vector<24x256xbf16>, vector<256x128xbf16>, vector<24x128xf32> -> vector<24x128xf32>
    %c0_15 = arith.constant 0 : index
    %c0_16 = arith.constant 0 : index
    %20 = vector.load %arg7[%c0_15, %c0_16] : memref<1x128xf32, #tpu.memory_space<vmem>>, vector<1x128xf32>
    %21 = vector.broadcast %20 : vector<1x128xf32> to vector<24x128xf32>
    %22 = arith.addf %19, %21 : vector<24x128xf32>
    %23 = arith.truncf %22 : vector<24x128xf32> to vector<24x128xbf16>
    %cst_17 = arith.constant 0.000000e+00 : bf16
    %24 = vector.broadcast %cst_17 : bf16 to vector<24x128xbf16>
    %25 = arith.maximumf %23, %24 : vector<24x128xbf16>
    %c0_18 = arith.constant 0 : index
    %c0_19 = arith.constant 0 : index
    %26 = vector.load %arg8[%c0_18, %c0_19] : memref<128x128xbf16, #tpu.memory_space<vmem>>, vector<128x128xbf16>
    %cst_20 = arith.constant dense<0.000000e+00> : vector<24x128xf32>
    %27 = tpu.matmul %25, %26, %cst_20 {dimension_numbers = #tpu.dot_dimension_numbers<[1], [0], [0], [1], [0, 0, 1, 1], [], []>} : vector<24x128xbf16>, vector<128x128xbf16>, vector<24x128xf32> -> vector<24x128xf32>
    %c0_21 = arith.constant 0 : index
    %c0_22 = arith.constant 0 : index
    %28 = vector.load %arg9[%c0_21, %c0_22] : memref<1x128xf32, #tpu.memory_space<vmem>>, vector<1x128xf32>
    %29 = vector.broadcast %28 : vector<1x128xf32> to vector<24x128xf32>
    %30 = arith.addf %27, %29 : vector<24x128xf32>
    %c0_23 = arith.constant 0 : index
    %c0_24 = arith.constant 0 : index
    %31 = vector.load %arg10[%c0_23, %c0_24] : memref<24x128xf32, #tpu.memory_space<vmem>>, vector<24x128xf32>
    tpu.vector_store %arg10[%c0_23, %c0_24], %30 {strides = array<i32>} : memref<24x128xf32, #tpu.memory_space<vmem>>, vector<24x128xf32>,
    return
  }
  func.func @transform_0(%arg0: i32) -> (i32, i32) {
    %c0_i32 = arith.constant 0 : i32
    %c0_i32_0 = arith.constant 0 : i32
    return %arg0, %c0_i32 : i32, i32
  }
  func.func @transform_1(%arg0: i32) -> (i32, i32) {
    %c0_i32 = arith.constant 0 : i32
    %c0_i32_0 = arith.constant 0 : i32
    %c0_i32_1 = arith.constant 0 : i32
    return %c0_i32, %c0_i32_0 : i32, i32
  }
  func.func @transform_2(%arg0: i32) -> (i32, i32) {
    %c0_i32 = arith.constant 0 : i32
    %c0_i32_0 = arith.constant 0 : i32
    %c0_i32_1 = arith.constant 0 : i32
    return %c0_i32, %c0_i32_0 : i32, i32
  }
  func.func @transform_3(%arg0: i32) -> (i32, i32) {
    %c0_i32 = arith.constant 0 : i32
    %c0_i32_0 = arith.constant 0 : i32
    %c0_i32_1 = arith.constant 0 : i32
    return %c0_i32, %c0_i32_0 : i32, i32
  }
  func.func @transform_4(%arg0: i32) -> (i32, i32) {
    %c0_i32 = arith.constant 0 : i32
    %c0_i32_0 = arith.constant 0 : i32
    %c0_i32_1 = arith.constant 0 : i32
    return %c0_i32, %c0_i32_0 : i32, i32
  }
  func.func @transform_5(%arg0: i32) -> (i32, i32) {
    %c0_i32 = arith.constant 0 : i32
    %c0_i32_0 = arith.constant 0 : i32
    %c0_i32_1 = arith.constant 0 : i32
    return %c0_i32, %c0_i32_0 : i32, i32
  }
  func.func @transform_6(%arg0: i32) -> (i32, i32) {
    %c0_i32 = arith.constant 0 : i32
    %c0_i32_0 = arith.constant 0 : i32
    %c0_i32_1 = arith.constant 0 : i32
    return %c0_i32, %c0_i32_0 : i32, i32
  }
  func.func @transform_7(%arg0: i32) -> (i32, i32) {
    %c0_i32 = arith.constant 0 : i32
    %c0_i32_0 = arith.constant 0 : i32
    %c0_i32_1 = arith.constant 0 : i32
    return %c0_i32, %c0_i32_0 : i32, i32
  }
  func.func @transform_8(%arg0: i32) -> (i32, i32) {
    %c0_i32 = arith.constant 0 : i32
    %c0_i32_0 = arith.constant 0 : i32
    %c0_i32_1 = arith.constant 0 : i32
    return %c0_i32, %c0_i32_0 : i32, i32
  }
  func.func @transform_9(%arg0: i32) -> (i32, i32) {
    %c0_i32 = arith.constant 0 : i32
    %c0_i32_0 = arith.constant 0 : i32
    return %arg0, %c0_i32 : i32, i32
  }
}

module attributes {stable_mosaic.version = 11 : i64} {
  func.func @mlp_kernel(%arg0: i32, %arg1: memref<24x32xf32, #tpu.memory_space<vmem>>, %arg2: memref<32x384xbf16, #tpu.memory_space<vmem>>, %arg3: memref<1x384xf32, #tpu.memory_space<vmem>>, %arg4: memref<384x256xbf16, #tpu.memory_space<vmem>>, %arg5: memref<1x256xf32, #tpu.memory_space<vmem>>, %arg6: memref<256x128xbf16, #tpu.memory_space<vmem>>, %arg7: memref<1x128xf32, #tpu.memory_space<vmem>>, %arg8: memref<128x128xbf16, #tpu.memory_space<vmem>>, %arg9: memref<1x128xf32, #tpu.memory_space<vmem>>, %arg10: memref<24x128xf32, #tpu.memory_space<vmem>>) attributes {dimension_semantics = [#tpu.dimension_semantics<parallel>], iteration_bounds = array<i64: 2>, scalar_prefetch = 0 : i64, scratch_operands = 0 : i64, tpu.core_type = #tpu.core_type<tc>, window_params = [{transform_indices = @transform_0, window_bounds = array<i64: 24, 32>}, {pipeline_mode = #tpu.pipeline_mode<synchronous>, transform_indices = @transform_1, window_bounds = array<i64: 32, 384>}, {pipeline_mode = #tpu.pipeline_mode<synchronous>, transform_indices = @transform_2, window_bounds = array<i64: 1, 384>}, {pipeline_mode = #tpu.pipeline_mode<synchronous>, transform_indices = @transform_3, window_bounds = array<i64: 384, 256>}, {pipeline_mode = #tpu.pipeline_mode<synchronous>, transform_indices = @transform_4, window_bounds = array<i64: 1, 256>}, {pipeline_mode = #tpu.pipeline_mode<synchronous>, transform_indices = @transform_5, window_bounds = array<i64: 256, 128>}, {pipeline_mode = #tpu.pipeline_mode<synchronous>, transform_indices = @transform_6, window_bounds = array<i64: 1, 128>}, {pipeline_mode = #tpu.pipeline_mode<synchronous>, transform_indices = @transform_7, window_bounds = array<i64: 128, 128>}, {pipeline_mode = #tpu.pipeline_mode<synchronous>, transform_indices = @transform_8, window_bounds = array<i64: 1, 128>}, {transform_indices = @transform_9, window_bounds = array<i64: 24, 128>}]} {
    %c0 = arith.constant 0 : index
    %c0_0 = arith.constant 0 : index
    %0 = vector.load %arg1[%c0, %c0_0] : memref<24x32xf32, #tpu.memory_space<vmem>>, vector<24x32xf32>
    %1 = arith.truncf %0 : vector<24x32xf32> to vector<24x32xbf16>
    %c0_1 = arith.constant 0 : index
    %c0_2 = arith.constant 0 : index
    %2 = vector.load %arg2[%c0_1, %c0_2] : memref<32x384xbf16, #tpu.memory_space<vmem>>, vector<32x384xbf16>
    %cst = arith.constant dense<0.000000e+00> : vector<24x384xf32>
    %3 = tpu.matmul %1, %2, %cst {dimension_numbers = #tpu.dot_dimension_numbers<[1], [0], [0], [1], [0, 0, 1, 1], [], []>} : vector<24x32xbf16>, vector<32x384xbf16>, vector<24x384xf32> -> vector<24x384xf32>
    %c0_3 = arith.constant 0 : index
    %c0_4 = arith.constant 0 : index
    %4 = vector.load %arg3[%c0_3, %c0_4] : memref<1x384xf32, #tpu.memory_space<vmem>>, vector<1x384xf32>
    %5 = vector.broadcast %4 : vector<1x384xf32> to vector<24x384xf32>
    %6 = arith.addf %3, %5 : vector<24x384xf32>
    %7 = arith.truncf %6 : vector<24x384xf32> to vector<24x384xbf16>
    %cst_5 = arith.constant 0.000000e+00 : bf16
    %8 = vector.broadcast %cst_5 : bf16 to vector<24x384xbf16>
    %9 = arith.maximumf %7, %8 : vector<24x384xbf16>
    %c0_6 = arith.constant 0 : index
    %c0_7 = arith.constant 0 : index
    %10 = vector.load %arg4[%c0_6, %c0_7] : memref<384x256xbf16, #tpu.memory_space<vmem>>, vector<384x256xbf16>
    %cst_8 = arith.constant dense<0.000000e+00> : vector<24x256xf32>
    %11 = tpu.matmul %9, %10, %cst_8 {dimension_numbers = #tpu.dot_dimension_numbers<[1], [0], [0], [1], [0, 0, 1, 1], [], []>} : vector<24x384xbf16>, vector<384x256xbf16>, vector<24x256xf32> -> vector<24x256xf32>
    %c0_9 = arith.constant 0 : index
    %c0_10 = arith.constant 0 : index
    %12 = vector.load %arg5[%c0_9, %c0_10] : memref<1x256xf32, #tpu.memory_space<vmem>>, vector<1x256xf32>
    %13 = vector.broadcast %12 : vector<1x256xf32> to vector<24x256xf32>
    %14 = arith.addf %11, %13 : vector<24x256xf32>
    %15 = arith.truncf %14 : vector<24x256xf32> to vector<24x256xbf16>
    %cst_11 = arith.constant 0.000000e+00 : bf16
    %16 = vector.broadcast %cst_11 : bf16 to vector<24x256xbf16>
    %17 = arith.maximumf %15, %16 : vector<24x256xbf16>
    %c0_12 = arith.constant 0 : index
    %c0_13 = arith.constant 0 : index
    %18 = vector.load %arg6[%c0_12, %c0_13] : memref<256x128xbf16, #tpu.memory_space<vmem>>, vector<256x128xbf16>
    %cst_14 = arith.constant dense<0.000000e+00> : vector<24x128xf32>
    %19 = tpu.matmul %17, %18, %cst_14 {dimension_numbers = #tpu.dot_dimension_numbers<[1], [0], [0], [1], [0, 0, 1, 1], [], []>} : vector<24x256xbf16>, vector<256x128xbf16>, vector<24x128xf32> -> vector<24x128xf32>
    %c0_15 = arith.constant 0 : index
    %c0_16 = arith.constant 0 : index
    %20 = vector.load %arg7[%c0_15, %c0_16] : memref<1x128xf32, #tpu.memory_space<vmem>>, vector<1x128xf32>
    %21 = vector.broadcast %20 : vector<1x128xf32> to vector<24x128xf32>
    %22 = arith.addf %19, %21 : vector<24x128xf32>
    %23 = arith.truncf %22 : vector<24x128xf32> to vector<24x128xbf16>
    %cst_17 = arith.constant 0.000000e+00 : bf16
    %24 = vector.broadcast %cst_17 : bf16 to vector<24x128xbf16>
    %25 = arith.maximumf %23, %24 : vector<24x128xbf16>
    %c0_18 = arith.constant 0 : index
    %c0_19 = arith.constant 0 : index
    %26 = vector.load %arg8[%c0_18, %c0_19] : memref<128x128xbf16, #tpu.memory_space<vmem>>, vector<128x128xbf16>
    %cst_20 = arith.constant dense<0.000000e+00> : vector<24x128xf32>
    %27 = tpu.matmul %25, %26, %cst_20 {dimension_numbers = #tpu.dot_dimension_numbers<[1], [0], [0], [1], [0, 0, 1, 1], [], []>} : vector<24x128xbf16>, vector<128x128xbf16>, vector<24x128xf32> -> vector<24x128xf32>
    %c0_21 = arith.constant 0 : index
    %c0_22 = arith.constant 0 : index
    %28 = vector.load %arg9[%c0_21, %c0_22] : memref<1x128xf32, #tpu.memory_space<vmem>>, vector<1x128xf32>
    %29 = vector.broadcast %28 : vector<1x128xf32> to vector<24x128xf32>
    %30 = arith.addf %27, %29 : vector<24x128xf32>
    %c0_23 = arith.constant 0 : index
    %c0_24 = arith.constant 0 : index
    %31 = vector.load %arg10[%c0_23, %c0_24] : memref<24x128xf32, #tpu.memory_space<vmem>>, vector<24x128xf32>
    tpu.vector_store %arg10[%c0_23, %c0_24], %30 {strides = array<i32>} : memref<24x128xf32, #tpu.memory_space<vmem>>, vector<24x128xf32>,
    return
  }
  func.func @transform_0(%arg0: i32) -> (i32, i32) {
    %c0_i32 = arith.constant 0 : i32
    %c0_i32_0 = arith.constant 0 : i32
    return %arg0, %c0_i32 : i32, i32
  }
  func.func @transform_1(%arg0: i32) -> (i32, i32) {
    %c0_i32 = arith.constant 0 : i32
    %c0_i32_0 = arith.constant 0 : i32
    %c0_i32_1 = arith.constant 0 : i32
    return %c0_i32, %c0_i32_0 : i32, i32
  }
  func.func @transform_2(%arg0: i32) -> (i32, i32) {
    %c0_i32 = arith.constant 0 : i32
    %c0_i32_0 = arith.constant 0 : i32
    %c0_i32_1 = arith.constant 0 : i32
    return %c0_i32, %c0_i32_0 : i32, i32
  }
  func.func @transform_3(%arg0: i32) -> (i32, i32) {
    %c0_i32 = arith.constant 0 : i32
    %c0_i32_0 = arith.constant 0 : i32
    %c0_i32_1 = arith.constant 0 : i32
    return %c0_i32, %c0_i32_0 : i32, i32
  }
  func.func @transform_4(%arg0: i32) -> (i32, i32) {
    %c0_i32 = arith.constant 0 : i32
    %c0_i32_0 = arith.constant 0 : i32
    %c0_i32_1 = arith.constant 0 : i32
    return %c0_i32, %c0_i32_0 : i32, i32
  }
  func.func @transform_5(%arg0: i32) -> (i32, i32) {
    %c0_i32 = arith.constant 0 : i32
    %c0_i32_0 = arith.constant 0 : i32
    %c0_i32_1 = arith.constant 0 : i32
    return %c0_i32, %c0_i32_0 : i32, i32
  }
  func.func @transform_6(%arg0: i32) -> (i32, i32) {
    %c0_i32 = arith.constant 0 : i32
    %c0_i32_0 = arith.constant 0 : i32
    %c0_i32_1 = arith.constant 0 : i32
    return %c0_i32, %c0_i32_0 : i32, i32
  }
  func.func @transform_7(%arg0: i32) -> (i32, i32) {
    %c0_i32 = arith.constant 0 : i32
    %c0_i32_0 = arith.constant 0 : i32
    %c0_i32_1 = arith.constant 0 : i32
    return %c0_i32, %c0_i32_0 : i32, i32
  }
  func.func @transform_8(%arg0: i32) -> (i32, i32) {
    %c0_i32 = arith.constant 0 : i32
    %c0_i32_0 = arith.constant 0 : i32
    %c0_i32_1 = arith.constant 0 : i32
    return %c0_i32, %c0_i32_0 : i32, i32
  }
  func.func @transform_9(%arg0: i32) -> (i32, i32) {
    %c0_i32 = arith.constant 0 : i32
    %c0_i32_0 = arith.constant 0 : i32
    return %arg0, %c0_i32 : i32, i32
  }
}

</mosaic_0001>

<bundles_post_ra>
// kernel: tpu_custom_call.1
= control target key start
LH: loop header
LB: loop body
LE: loop exit
PB: predicated region body
PF: predicated region fallthrough
CT: control target
= control target key end

     0   :  { %s2232_s0 = inlined_call_operand.vmem [shape: f32[48,32], index: 0, kind: input, shape index: {}]   ;;  %s2233_s1 = inlined_call_operand.hbm [shape: bf16[32,384], index: 1, kind: input, shape index: {}]   ;;  %s2234_s2 = inlined_call_operand.vmem [shape: f32[1,384], index: 2, kind: input, shape index: {}]   ;;  %s2235_s3 = inlined_call_operand.hbm [shape: bf16[384,256], index: 3, kind: input, shape index: {}]   ;;  %s2236_s4 = inlined_call_operand.vmem [shape: f32[1,256], index: 4, kind: input, shape index: {}]   ;;  %s2237_s5 = inlined_call_operand.hbm [shape: bf16[256,128], index: 5, kind: input, shape index: {}]   ;;  %s2238_s6 = inlined_call_operand.vmem [shape: f32[1,128], index: 6, kind: input, shape index: {}]   ;;  %s2239_s7 = inlined_call_operand.vmem [shape: bf16[128,128], index: 7, kind: input, shape index: {}]   ;;  %s2240_s8 = inlined_call_operand.vmem [shape: f32[1,128], index: 8, kind: input, shape index: {}]   ;;  %s2241_s9 = inlined_call_operand.hbm [shape: f32[48,128], index: 9, kind: output, shape index: {}]  }
   0x1   :  { %2249 = sst [smem:[#allocation16_spill]] %s2235_s3 }
   0x2   :  { %14 = vsyncpa [#allocation3], 0 }
   0x3   :  { %15 = vsyncpa [#allocation6], 0 }
   0x4   :  { %16 = vsyncpa [#allocation4], 0 }
   0x5   :  { %18 = vsyncpa [#allocation4 + $0x1], 0  ;;  %s1971_s30 = smov 0   ;;  %s1973_s10 = smov 0  }
   0x6   :  { %s1975_s11 = smov 0   ;;  %s1977_s12 = smov 0  }
   0x7 LB: > { %2250 = sst [smem:[#allocation12_spill]] %s1902_s11  ;;  %s1992_s13 = sadd.s32 4294967295, %s1906_s12   ;;  %s1906_s12 = sphi %s1977_s12, %s2268_s12   ;;  %s1902_s11 = sphi %s1975_s11, %s2270_s11   ;;  %s1898_s10 = sphi %s1973_s10, %s2272_s10   ;;  %s1894_s30 = sphi %s1971_s30, %s2271_s30  }
   0x8   : > { %s1385_s14 = sadd.s32 4294967294, %s1906_s12   ;;  %s1996_s15 = sadd.s32 1, %s1906_s12  }
   0x9   : > { %2251 = sst [smem:[#allocation13_spill]] %s1996_s15  ;;  %s225_s16 = sadd.s32 1, %s1902_s11 }
   0xa   : > { %s222_s17 = ssub.s32 %s1906_s12, %s1996_s15  ;;  %p235_p0 = scmp.ne.s32.totalorder %s1902_s11, %s1898_s10 }
   0xb   : > { %p223_p1 = scmp.eq.s32.totalorder %s222_s17, 0  ;;  %p236_p2 = scmp.eq.s32.totalorder %s1992_s13, 1 }
   0xc   : > { %p241_p3 = scmp.ne.s32.totalorder %s1898_s10, %s1894_s30  ;;  %p242_p4 = scmp.eq.s32.totalorder %s1385_s14, 1 }
   0xd   : > { %s2007_s18 = scalar_select %p223_p1, %s1902_s11, %s225_s16  }
   0xe   : > { %p2009_p5 = por %p236_p2, %p235_p0  ;;  %p2013_p6 = por %p242_p4, %p241_p3 }
   0xf   : > { %2252 = sst [smem:[#allocation14_spill]] %s2007_s18  ;;  %p1386_p7 = scmp.ge.s32.totalorder %s1906_s12, 1 }
  0x10   : > { %s2253_s19 = scalar_select %p2009_p5, 1, 0 }
  0x11   : > { %s2254_s20 = scalar_select %p2013_p6, 1, 0 }
  0x12   : > { %p249_p8 = scmp.lt.s32.totalorder %s1906_s12, 3  ;;  %p2242_p9 = scmp.eq.s32.totalorder %s1992_s13, 0 }
  0x13   : > { %2255 = sst [smem:[#allocation15_spill]] %s2254_s20  ;;  %s1908_s22 = smov [#allocation5]  }
  0x14   : > { %p2020_p10 = pnand %p1386_p7, %p249_p8  ;;  %s277_s23 = sshll.u32 %s1908_s22, 4  ;;  %s278_s23 = int_to_ptr.vmem [resolvable:$true] %s277_s23 }
  0x15   : > { %s1909_s25 = smov [#allocation2]   ;;  %s2258_s3 = sld [smem:[#allocation16_spill]] }
  0x16   : > { %s2256_s21 = scalar_select %p2020_p10, 1, 0 }
  0x17   : > { %p1583_p11 = pneg %p2020_p10  ;;  %s261_s26 = sshll.u32 %s1909_s25, 4  ;;  %s2032_s26 = int_to_ptr.vmem [resolvable:$true] %s261_s26 }
  0x19   : > { %p2028_p12 = pnand %p2242_p9, %p1583_p11 }
  0x1b   : > { %s1752_s29 = scalar_lea.hbm %s2258_s3, 6144  ;;  %p2042_p0 = pneg %p2028_p12 }
  0x1c   : > { %p1753_p13 = scmp.ne.s32.totalorder %s2258_s3, %s1752_s29  ;;  %p1759_p3 = scmp.lt.u32.totalorder %s1752_s29, %s2258_s3 }
  0x1e   : > { %p1755_p1 = pnand %p2042_p0, %p1753_p13 }
  0x20   : > { %p1756_p2 = pneg %p1755_p1 }
  0x22   : > { %p1761_p4 = pnand %p1759_p3, %p1756_p2 }
  0x24   : > { %1764 = shalt.err (!%p1761_p4)
}
  0x25   : > { %s1765_s27 = scalar_lea.vmem %s278_s23, 6144  ;;  %p1773_p9 = scmp.lt.s32.totalorder %s278_s23, %s278_s23 }
  0x26   : > { %p1766_p7 = scmp.ne.s32.totalorder %s278_s23, %s1765_s27  ;;  %p1774_p6 = scmp.lt.s32.totalorder %s1765_s27, %s1765_s27 }
  0x28   : > { %p1768_p8 = pnand %p1766_p7, %p2042_p0  ;;  %p1775_p5 = por %p1774_p6, %p1773_p9 }
  0x2a   : > { %p1769_p11 = pneg %p1768_p8 }
  0x2c   : > { %p1776_p10 = pnand %p1775_p5, %p1769_p11 }
  0x2e   : > { %1779 = shalt.err (!%p1776_p10)
}
  0x2f   : > { %s1910_s28 = smov 128   ;;  %s1911_s14 = smov 8  }
  0x30   : > { %1589 = dma.hbm_to_vmem [thread:$0]  (!%p2028_p12), %s2258_s3, 6144, %s278_s23, [#allocation6], %s1910_s28, %s1910_s28, %s1911_s14  }
  0x31   : > { %s1780_s18 = scalar_lea.hbm %s2233_s1, 768 }
  0x32   : > { %p1781_p13 = scmp.ne.s32.totalorder %s2233_s1, %s1780_s18  ;;  %p1787_p9 = scmp.lt.u32.totalorder %s1780_s18, %s2233_s1 }
  0x34   : > { %p1783_p5 = pnand %p1781_p13, %p2042_p0 }
  0x36   : > { %p1784_p6 = pneg %p1783_p5 }
  0x38   : > { %p1789_p10 = pnand %p1787_p9, %p1784_p6 }
  0x3a   : > { %1792 = shalt.err (!%p1789_p10)
}
  0x3b   : > { %s1793_s23 = scalar_lea.vmem %s2032_s26, 768  ;;  %p1801_p4 = scmp.lt.s32.totalorder %s2032_s26, %s2032_s26 }
  0x3c   : > { %p1794_p1 = scmp.ne.s32.totalorder %s2032_s26, %s1793_s23  ;;  %p1802_p7 = scmp.lt.s32.totalorder %s1793_s23, %s1793_s23 }
  0x3e   : > { %p1796_p2 = pnand %p1794_p1, %p2042_p0  ;;  %p1803_p8 = por %p1802_p7, %p1801_p4 }
  0x40   : > { %p1797_p3 = pneg %p1796_p2 }
  0x42   : > { %p1804_p11 = pnand %p1803_p8, %p1797_p3 }
  0x44   : > { %1807 = shalt.err (!%p1804_p11)
}
  0x45   : > { %s1912_s11 = smov 192   ;;  %s1913_s15 = smov 12  }
  0x46   : > { %1586 = dma.hbm_to_vmem [thread:$0]  (!%p2028_p12), %s2233_s1, 768, %s2032_s26, [#allocation3], %s1912_s11, %s1912_s11, %s1913_s15  }
  0x47   : > { %s1914_s28 = smov [#allocation7]   ;;  %s1808_s22 = scalar_lea.hbm %s2237_s5, 2048 }
  0x48   : > { %s293_s14 = sshll.u32 %s1914_s28, 4  ;;  %p1809_p13 = scmp.ne.s32.totalorder %s2237_s5, %s1808_s22  ;;  %s294_s14 = int_to_ptr.vmem [resolvable:$true] %s293_s14 }
  0x49   : > { %p1815_p9 = scmp.lt.u32.totalorder %s1808_s22, %s2237_s5 }
  0x4a   : > { %p1811_p5 = pnand %p1809_p13, %p2042_p0 }
  0x4c   : > { %p1812_p6 = pneg %p1811_p5 }
  0x4e   : > { %p1817_p10 = pnand %p1815_p9, %p1812_p6 }
  0x50   : > { %1820 = shalt.err (!%p1817_p10)
}
  0x51   : > { %s1821_s26 = scalar_lea.vmem %s294_s14, 2048  ;;  %p1829_p4 = scmp.lt.s32.totalorder %s294_s14, %s294_s14 }
  0x52   : > { %p1822_p1 = scmp.ne.s32.totalorder %s294_s14, %s1821_s26  ;;  %p1830_p7 = scmp.lt.s32.totalorder %s1821_s26, %s1821_s26 }
  0x54   : > { %p1824_p2 = pnand %p1822_p1, %p2042_p0  ;;  %p1831_p8 = por %p1830_p7, %p1829_p4 }
  0x56   : > { %p1825_p3 = pneg %p1824_p2 }
  0x58   : > { %p1832_p11 = pnand %p1831_p8, %p1825_p3 }
  0x5a   : > { %1835 = shalt.err (!%p1832_p11)
}
  0x5b   : > { %s1915_s11 = smov 64   ;;  %s1916_s15 = smov 4  }
  0x5c   : > { %1592 = dma.hbm_to_vmem [thread:$0]  (!%p2028_p12), %s2237_s5, 2048, %s294_s14, [#allocation6], %s1915_s11, %s1915_s11, %s1916_s15  }
  0x5d   : > { %p2260_p13 = scmp.ne.s32.totalorder %s2256_s21, 0 }
  0x5e   : > { %p2261_p5 = scmp.eq.s32.totalorder (!%p2260_p13), %s1992_s13, 0 }
  0x5f   : > { %327 = sbr.rel (%p2260_p13) target bundleno = 1054 (0x41e), region = 56 }
  0x66   : > { %1881 = dma.done.wait (%p2261_p5), [#allocation3], 768   ;;  %p2262_p0 = pmov %p2261_p5 }
  0x68   : > { %1883 = vsyncadd (%p2262_p0), [#allocation3], 4294966528  ;;  %p2263_p6 = pmov %p2262_p0 }
  0x69   : > { %p2264_p9 = pmov %p2262_p0 }
  0x6a   : > { %1885 = dma.done.wait (%p2263_p6), [#allocation6], 8192  }
  0x6b   : > { %1887 = vsyncadd (%p2264_p9), [#allocation6], 4294959104  ;;  %s371_s24 = smul.u32 3, %s1992_s13  ;;  %v1917_v0 = vmov 0   ;;  %v1648_v1 = vld [vmem:[#allocation2 + $0x4] ss:$12 sps:$4 sm:$0xff]   ;;  %v394_v56 = vlaneseq }
  0x6c   : > { %480 = vmatprep.mubr.bf16.mxu1 %v1917_v0  ;;  %v1650_v2 = vld [vmem:[#allocation2] ss:$12 sps:$4 sm:$0xff]   ;;  %448 = vmatprep.subr.bf16.mxu1 %v1648_v1  ;;  %v1651_v3 = vld [vmem:[#allocation2 + $0x1c] ss:$12 sps:$4 sm:$0xff]   ;;  %v1653_v4 = vld [vmem:[#allocation2 + $0x18] ss:$12 sps:$4 sm:$0xff]  }
  0x6d   : > { %p372_p12 = scmp.lt.s32.totalorder %s371_s24, 5  ;;  %449 = vmatpush1.bf16.msra.mxu1 %v1650_v2  ;;  %v1654_v7 = vld [vmem:[#allocation2 + $0x8] ss:$12 sps:$4 sm:$0xff]   ;;  %v1658_v10 = vld [vmem:[#allocation5] ss:$8 sps:$4 sm:$0xff]   ;;  %vm441_vm0 = vcmask 261120  }
  0x6e   : > { %450 = vmatprep.subr.bf16.mxu1 %v1651_v3  ;;  %v1656_v9 = vld [vmem:[#allocation5 + $0x4] ss:$8 sps:$4 sm:$0xff]   ;;  %v1659_v11 = vld [vmem:[#allocation5 + $0x14] ss:$8 sps:$4 sm:$0xff]   ;;  %v1661_v13 = vld [vmem:[#allocation5 + $0x10] ss:$8 sps:$4 sm:$0xff]  }
  0x6f   : > { %s2274_s24 = smov (!%p372_p12, %s371_s24), 5  ;;  %v1655_v12 = vld [vmem:[#allocation2 + $0x20] ss:$12 sps:$4 sm:$0xff]   ;;  %859 = vmatprep.subr.bf16.mxu0 %v1656_v9  ;;  %v1662_v14 = vld [vmem:[#allocation5 + $0x24] ss:$8 sps:$4 sm:$0xff]   ;;  %v2119_v57 = vshrl.u32 %v394_v56, 7 }
  0x70   : > { %s1395_s21 = sshll.u32 %s2274_s24, 3  ;;  %860 = vmatpush1.bf16.msra.mxu0 %v1658_v10  ;;  %v1664_v16 = vld [vmem:[#allocation5 + $0x20] ss:$8 sps:$4 sm:$0xff]   ;;  %v1665_v18 = vld [vmem:[#allocation5 + $0x34] ss:$8 sps:$4 sm:$0xff]   ;;  %s368_s27 = sand.u32 1, %s1898_s10  }
  0x71   : > { %s375_s28 = scalar_lea.vmem %s2232_s0, %s1395_s21  ;;  %451 = vmatpush1.bf16.msra.mxu1 %v1653_v4  ;;  %861 = vmatprep.subr.bf16.mxu0 %v1659_v11  ;;  %v1667_v19 = vld [vmem:[#allocation5 + $0x30] ss:$8 sps:$4 sm:$0xff]   ;;  %v1668_v20 = vld [vmem:[#allocation5 + $0x44] ss:$8 sps:$4 sm:$0xff]   ;;  %v1670_v21 = vld [vmem:[#allocation5 + $0x40] ss:$8 sps:$4 sm:$0xff]  }
  0x72   : > { %v379_v5 = vld [vmem:[%s375_s28] sm:$0xff]  ;;  %v380_v6 = vld [vmem:[%s375_s28 + $0x8] sm:$0xff]  ;;  %1526 = vmatprep.subr.bf16.mxu1 %v1654_v7  ;;  %v381_v15 = vld [vmem:[%s375_s28 + $0x10] sm:$0xff]  ;;  %v396_v58 = vsub.s32 0, %v2119_v57  ;;  %v400_v60 = vsub.s32 1, %v2119_v57  ;;  %s1568_s23 = smul.u32 24, %s368_s27 }
  0x73   : > { %v382_v8 = vpack.c.bf16 %v380_v6, %v379_v5  ;;  %v383_v17 = vpack.c.bf16 %v381_v15, %v381_v15  ;;  %v1671_v22 = vld [vmem:[#allocation5 + $0x54] ss:$8 sps:$4 sm:$0xff]   ;;  %v1673_v23 = vld [vmem:[#allocation5 + $0x50] ss:$8 sps:$4 sm:$0xff]   ;;  %v1674_v24 = vld [vmem:[#allocation5 + $0x64] ss:$8 sps:$4 sm:$0xff]  }
  0x74   : > { %862 = vmatpush1.bf16.msra.mxu0 %v1661_v13  ;;  %v1676_v25 = vld [vmem:[#allocation5 + $0x60] ss:$8 sps:$4 sm:$0xff]   ;;  %v1677_v26 = vld [vmem:[#allocation5 + $0x74] ss:$8 sps:$4 sm:$0xff]   ;;  %v1679_v27 = vld [vmem:[#allocation5 + $0x70] ss:$8 sps:$4 sm:$0xff]  }
  0x75   : > { %1402 = vmatmul.mubr.msk.bf16.vlgmr.msra.gmra.mrb[0].mxu1 %vm441_vm0, %v382_v8  ;;  %863 = vmatprep.subr.bf16.mxu0 %v1662_v14  ;;  %v1680_v28 = vld [vmem:[#allocation5 + $0x84] ss:$8 sps:$4 sm:$0xff]   ;;  %v1682_v29 = vld [vmem:[#allocation5 + $0x80] ss:$8 sps:$4 sm:$0xff]   ;;  %v1683_v30 = vld [vmem:[#allocation5 + $0x94] ss:$8 sps:$4 sm:$0xff]  }
  0x76   : > { %1527 = vmatpush3.bf16.msra.mxu1 %v1654_v7  ;;  %490 = vmatprep.mubr.bf16.mxu1 %v1917_v0  ;;  %v1685_v31 = vld [vmem:[#allocation5 + $0x90] ss:$8 sps:$4 sm:$0xff]   ;;  %v1686_v32 = vld [vmem:[#allocation5 + $0xa4] ss:$8 sps:$4 sm:$0xff]   ;;  %v1688_v33 = vld [vmem:[#allocation5 + $0xa0] ss:$8 sps:$4 sm:$0xff]  }
  0x77   : > { %1528 = vmatprep.subr.bf16.mxu1 %v1655_v12  ;;  %v1689_v34 = vld [vmem:[#allocation5 + $0xb4] ss:$8 sps:$4 sm:$0xff]   ;;  %v1691_v35 = vld [vmem:[#allocation5 + $0xb0] ss:$8 sps:$4 sm:$0xff]   ;;  %v1692_v36 = vld [vmem:[#allocation5 + $0xc4] ss:$8 sps:$4 sm:$0xff]  }
  0x78   : > { %864 = vmatpush1.bf16.msra.mxu0 %v1664_v16  ;;  %v1694_v37 = vld [vmem:[#allocation5 + $0xc0] ss:$8 sps:$4 sm:$0xff]   ;;  %v1695_v38 = vld [vmem:[#allocation5 + $0xd4] ss:$8 sps:$4 sm:$0xff]   ;;  %v1697_v39 = vld [vmem:[#allocation5 + $0xd0] ss:$8 sps:$4 sm:$0xff]  }
  0x79   : > { %865 = vmatprep.subr.bf16.mxu0 %v1665_v18  ;;  %v1698_v40 = vld [vmem:[#allocation5 + $0xe4] ss:$8 sps:$4 sm:$0xff]   ;;  %v1700_v41 = vld [vmem:[#allocation5 + $0xe0] ss:$8 sps:$4 sm:$0xff]   ;;  %v1701_v42 = vld [vmem:[#allocation5 + $0xf4] ss:$8 sps:$4 sm:$0xff]  }
  0x7a   : > { %1529 = vmatpush3.bf16.msra.mxu1 %v1655_v12  ;;  %v1703_v43 = vld [vmem:[#allocation5 + $0xf0] ss:$8 sps:$4 sm:$0xff]   ;;  %v1706_v44 = vld [vmem:[#allocation5 + $0x104] ss:$8 sps:$4 sm:$0xff]   ;;  %v392_v59 = vld [vmem:[%s2234_s2] sm:$0x7] }
  0x7b   : > { %v1728_v45 = vld [vmem:[#allocation7 + $0x40] sm:$0xff]   ;;  %v1730_v47 = vld [vmem:[#allocation7 + $0x48] sm:$0xff]   ;;  %v1732_v49 = vld [vmem:[#allocation7 + $0x50] sm:$0xff]   ;;  %v397_v61 = vrot.slane %v392_v59, %v396_v58  ;;  %v401_v63 = vrot.slane %v392_v59, %v400_v60  ;;  %s1483_s15 = smul.u32 384, %s1992_s13  ;;  %s370_s18 = scalar_lea.vmem [#allocation8], %s1568_s23 }
  0x7c   : > { %866 = vmatpush1.bf16.msra.mxu0 %v1667_v19  ;;  %v1729_v46 = vld [vmem:[#allocation7] sm:$0xff]   ;;  %1488 = vmatprep.subr.bf16.mxu1 %v1728_v45  ;;  %v1731_v48 = vld [vmem:[#allocation7 + $0x8] sm:$0xff]   ;;  %v1733_v50 = vld [vmem:[#allocation7 + $0x10] sm:$0xff]   ;;  %v404_v19 = vsub.s32 2, %v2119_v57  ;;  %s1292_s3 = sshll.u32 %s370_s18, 4  ;;  %s2191_s13 = scalar_lea.sflag [#allocation4], %s368_s27  ;;  %s2184_s3 = int_to_ptr.vmem [resolvable:$true] %s1292_s3 }
  0x7d   : > { %1403 = vmatmul.mubr.msk.bf16.gmra.mrb[4].mxu1 %vm441_vm0, %v383_v17  ;;  %867 = vmatprep.subr.bf16.mxu0 %v1668_v20  ;;  %v1734_v51 = vld [vmem:[#allocation7 + $0x58] sm:$0xff]   ;;  %v1736_v53 = vld [vmem:[#allocation7 + $0x60] sm:$0xff]   ;;  %v1738_v55 = vld [vmem:[#allocation7 + $0x68] sm:$0xff]   ;;  %s2189_s17 = scalar_lea.hbm %s2241_s9, %s1483_s15  ;;  %s1836_s20 = scalar_lea.vmem %s2184_s3, 384 }
  0x7e   : > { %1530 = vmatprep.mubr.msk.bf16.mxu1 %vm441_vm0, %v382_v8  ;;  %v1735_v52 = vld [vmem:[#allocation7 + $0x18] sm:$0xff]   ;;  %v1737_v54 = vld [vmem:[#allocation7 + $0x20] sm:$0xff]   ;;  %v1745_v57 = vld [vmem:[%s2239_s7 + $0x8] sm:$0xff]   ;;  %p1837_p10 = scmp.ne.s32.totalorder %s2184_s3, %s1836_s20  ;;  %p2265_p1 = scmp.ne.s32.totalorder %s2253_s19, 0 }
  0x7f   : > { %v1704_v11 = vld [vmem:[#allocation5 + $0x100] ss:$8 sps:$4 sm:$0xff]   ;;  %v1709_v14 = vld [vmem:[#allocation5 + $0x114] ss:$8 sps:$4 sm:$0xff]   ;;  %v1725_v45 = vld [vmem:[#allocation5 + $0x170] ss:$8 sps:$4 sm:$0xff]  }
  0x80   : > { %868 = vmatpush1.bf16.msra.mxu0 %v1670_v21  ;;  %v607_v56 = vld [vmem:[%s2236_s4] sm:$0x3]  ;;  %p1838_p2 = pnand %p1837_p10, %p2265_p1  ;;  %s1918_s28 = smov [#allocation8]  }
  0x81   : > { %869 = vmatprep.subr.bf16.mxu0 %v1671_v22  ;;  %v1707_v22 = vld [vmem:[#allocation5 + $0x110] ss:$8 sps:$4 sm:$0xff]   ;;  %s1840_s14 = sshll.u32 %s1918_s28, 4  ;;  %s1841_s14 = int_to_ptr.vmem [resolvable:$false] %s1840_s14 }
  0x82   : > { %p1839_p3 = pneg %p1838_p2  ;;  %s1842_s16 = scalar_lea.vmem %s1841_s14, 768 }
  0x83   : > { %p1843_p4 = scmp.lt.s32.totalorder %s2184_s3, %s1841_s14  ;;  %p1844_p7 = scmp.lt.s32.totalorder %s1842_s16, %s1836_s20 }
  0x84   : > { %870 = vmatpush1.bf16.msra.mxu0 %v1673_v23 }
  0x85   : > { %1531 = vmatmul.mubr.msk.bf16.vlgmr.msra.gmra.mrb[8].mxu1 %vm441_vm0, %v383_v17  ;;  %871 = vmatprep.subr.bf16.mxu0 %v1674_v24  ;;  %v1712_v24 = vld [vmem:[#allocation5 + $0x124] ss:$8 sps:$4 sm:$0xff]   ;;  %p1845_p8 = por %p1844_p7, %p1843_p4 }
  0x86   : > { %1489 = vmatpush3.bf16.msra.mxu1 %v1729_v46 }
  0x87   : > { %1490 = vmatprep.subr.bf16.mxu1 %v1730_v47  ;;  %p1846_p11 = pnand %p1845_p8, %p1839_p3 }
  0x88   : > { %872 = vmatpush1.bf16.msra.mxu0 %v1676_v25 }
  0x89   : > { %873 = vmatprep.subr.bf16.mxu0 %v1677_v26  ;;  %v405_v26 = vrot.slane %v392_v59, %v404_v19  ;;  %v612_v59 = vrot.slane %v607_v56, %v396_v58 }
  0x8a   : > { %1491 = vmatpush3.bf16.msra.mxu1 %v1731_v48 }
  0x8b   : > { %1492 = vmatprep.subr.bf16.mxu1 %v1732_v49 }
  0x8c   : > { %874 = vmatpush1.bf16.msra.mxu0 %v1679_v27 }
  0x8d   : > { %875 = vmatprep.subr.bf16.mxu0 %v1680_v28  ;;  %v1710_v28 = vld [vmem:[#allocation5 + $0x120] ss:$8 sps:$4 sm:$0xff]  }
  0x8e   : > { %1493 = vmatpush3.bf16.msra.mxu1 %v1733_v50  ;;  %v1739_v50 = vld [vmem:[#allocation7 + $0x28] sm:$0xff]  }
  0x8f   : > { %1494 = vmatprep.subr.bf16.mxu1 %v1734_v51  ;;  %v1740_v51 = vld [vmem:[#allocation7 + $0x70] sm:$0xff]  }
  0x90   : > { %876 = vmatpush1.bf16.msra.mxu0 %v1682_v29 }
  0x91   : > { %877 = vmatprep.subr.bf16.mxu0 %v1683_v30  ;;  %v1715_v30 = vld [vmem:[#allocation5 + $0x134] ss:$8 sps:$4 sm:$0xff]  }
  0x92   : > { %1495 = vmatpush3.bf16.msra.mxu1 %v1735_v52  ;;  %v1741_v52 = vld [vmem:[#allocation7 + $0x30] sm:$0xff]  }
  0x93   : > { %1496 = vmatprep.subr.bf16.mxu1 %v1736_v53  ;;  %v1742_v53 = vld [vmem:[#allocation7 + $0x78] sm:$0xff]  }
  0x94   : > { %878 = vmatpush1.bf16.msra.mxu0 %v1685_v31 }
  0x95   : > { %879 = vmatprep.subr.bf16.mxu0 %v1686_v32 }
  0x96   : > { %1497 = vmatpush3.bf16.msra.mxu1 %v1737_v54  ;;  %v1743_v54 = vld [vmem:[#allocation7 + $0x38] sm:$0xff]  }
  0x97   : > { %1498 = vmatprep.subr.bf16.mxu1 %v1738_v55  ;;  %v1744_v55 = vld [vmem:[%s2239_s7] sm:$0xff]  }
  0x98   : > { %880 = vmatpush1.bf16.msra.mxu0 %v1688_v33 }
  0x99   : > { %881 = vmatprep.subr.bf16.mxu0 %v1689_v34 }
  0x9a   : > { %1499 = vmatpush3.bf16.msra.mxu1 %v1739_v50 }
  0x9b   : > { %1500 = vmatprep.subr.bf16.mxu1 %v1740_v51 }
  0x9c   : > { %882 = vmatpush1.bf16.msra.mxu0 %v1691_v35  ;;  %v1713_v35 = vld [vmem:[#allocation5 + $0x130] ss:$8 sps:$4 sm:$0xff]  }
  0x9d   : > { %883 = vmatprep.subr.bf16.mxu0 %v1692_v36 }
  0x9e   : > { %1501 = vmatpush3.bf16.msra.mxu1 %v1741_v52 }
  0x9f   : > { %1502 = vmatprep.subr.bf16.mxu1 %v1742_v53 }
  0xa0   : > { %884 = vmatpush1.bf16.msra.mxu0 %v1694_v37  ;;  %v1718_v37 = vld [vmem:[#allocation5 + $0x144] ss:$8 sps:$4 sm:$0xff]  }
  0xa1   : > { %885 = vmatprep.subr.bf16.mxu0 %v1695_v38 }
  0xa2   : > { %1503 = vmatpush3.bf16.msra.mxu1 %v1743_v54 }
  0xa3   : > { %1534 = vmatprep.subr.bf16.mxu1 %v1744_v55 }
  0xa4   : > { %886 = vmatpush1.bf16.msra.mxu0 %v1697_v39  ;;  %v1716_v39 = vld [vmem:[#allocation5 + $0x140] ss:$8 sps:$4 sm:$0xff]  }
  0xa5   : > { %887 = vmatprep.subr.bf16.mxu0 %v1698_v40  ;;  %v1721_v40 = vld [vmem:[#allocation5 + $0x154] ss:$8 sps:$4 sm:$0xff]  }
  0xa8   : > { %888 = vmatpush1.bf16.msra.mxu0 %v1700_v41  ;;  %v1719_v41 = vld [vmem:[#allocation5 + $0x150] ss:$8 sps:$4 sm:$0xff]  }
  0xa9   : > { %889 = vmatprep.subr.bf16.mxu0 %v1701_v42  ;;  %v1724_v42 = vld [vmem:[#allocation5 + $0x164] ss:$8 sps:$4 sm:$0xff]  }
  0xac   : > { %890 = vmatpush1.bf16.msra.mxu0 %v1703_v43  ;;  %v1722_v43 = vld [vmem:[#allocation5 + $0x160] ss:$8 sps:$4 sm:$0xff]  }
  0xad   : > { %910 = vmatprep.subr.bf16.mxu0 %v1706_v44  ;;  %v1727_v44 = vld [vmem:[#allocation5 + $0x174] ss:$8 sps:$4 sm:$0xff]  }
 0x148   : > { %v482_v62 = vpop.f32.mrb[0].mxu1 }
 0x149   : > { %v484_v1 = vpop.f32.mrb[1].mxu1  ;;  %v483_v3 = vadd.f32 %v482_v62, %v397_v61  ;;  %v616_v62 = vrot.slane %v607_v56, %v400_v60 }
 0x14a   : > { %v486_v2 = vpop.f32.mrb[2].mxu1  ;;  %v485_v6 = vadd.f32 %v484_v1, %v401_v63 }
 0x14b   : > { %v487_v4 = vadd.f32 %v486_v2, %v397_v61  ;;  %v488_v5 = vpop.f32.mrb[3].mxu1 }
 0x14c   : > { %v489_v7 = vadd.f32 %v488_v5, %v401_v63 }
 0x14d   : > { %v547_v8 = vpack.c.bf16 %v487_v4, %v483_v3 }
 0x14e   : > { %v548_v9 = vpack.c.bf16 %v489_v7, %v485_v6 }
 0x14f   : > { %v553_v13 = vmax.bf16 %v1917_v0, %v547_v8 }
 0x150   : > { %v554_v10 = vmax.bf16 %v1917_v0, %v548_v9  ;;  %v492_v12 = vpop.f32.mrb[4].mxu1 }
 0x151   : > { %v493_v15 = vadd.f32 %v492_v12, %v397_v61  ;;  %v494_v16 = vpop.f32.mrb[5].mxu1 }
 0x152   : > { %891 = vmatprep.mubr.bf16.mxu0 %v554_v10  ;;  %v495_v17 = vadd.f32 %v494_v16, %v401_v63  ;;  %v496_v18 = vpop.f32.mrb[6].mxu1 }
 0x153   : > { %892 = vmatmul.mubr.bf16.vlgmr.msra.gmra.mrb[0].mxu0 %v553_v13  ;;  %v550_v20 = vpack.c.bf16 %v493_v15, %v493_v15  ;;  %v497_v21 = vpop.f32.mrb[7].mxu1 }
 0x154   : > { %911 = vmatpush1.bf16.msra.mxu0 %v1704_v11  ;;  %v551_v23 = vpack.c.bf16 %v495_v17, %v495_v17  ;;  %v1746_v17 = vld [vmem:[%s2239_s7 + $0x10] sm:$0xff]   ;;  %v1748_v21 = vld [vmem:[%s2239_s7 + $0x20] sm:$0xff]  }
 0x155   : > { %912 = vmatprep.subr.bf16.mxu0 %v1709_v14  ;;  %v556_v27 = vmax.bf16 %v1917_v0, %v550_v20  ;;  %v1747_v20 = vld [vmem:[%s2239_s7 + $0x18] sm:$0xff]  }
 0x156   : > { %v557_v25 = vmax.bf16 %v1917_v0, %v551_v23  ;;  %v1750_v23 = vld [vmem:[%s2239_s7 + $0x30] sm:$0xff]  }
 0x158   : > { %913 = vmatpush1.bf16.msra.mxu0 %v1707_v22  ;;  %v1532_v29 = vpop.f32.mrb[8].mxu1  ;;  %901 = vmatprep.mubr.bf16.mxu0 %v557_v25  ;;  %v1749_v22 = vld [vmem:[%s2239_s7 + $0x28] sm:$0xff]  }
 0x159   : > { %914 = vmatprep.subr.bf16.mxu0 %v1712_v24  ;;  %v533_v31 = vpop.f32.mrb[9].mxu1  ;;  %v542_v46 = vadd.f32 %v1532_v29, %v405_v26  ;;  %v1751_v24 = vld [vmem:[%s2239_s7 + $0x38] sm:$0xff]   ;;  %v1454_v29 = vld [vmem:[%s2238_s6] ss:$0 sm:$0xff] }
 0x15a   : > { %v534_v32 = vadd.f32 %v533_v31, %v405_v26  ;;  %v1533_v33 = vpop.f32.mrb[10].mxu1 }
 0x15b   : > { %902 = vmatmul.mubr.bf16.gmra.mrb[4].mxu0 %v556_v27  ;;  %v536_v34 = vpop.f32.mrb[11].mxu1  ;;  %v552_v48 = vpack.c.bf16 %v542_v46, %v542_v46 }
 0x15c   : > { %915 = vmatpush1.bf16.msra.mxu0 %v1710_v28  ;;  %v537_v36 = vadd.f32 %v536_v34, %v405_v26  ;;  %942 = vmatprep.mubr.bf16.mxu0 %v1917_v0 }
 0x15d   : > { %916 = vmatprep.subr.bf16.mxu0 %v1715_v30  ;;  %v558_v49 = vmax.bf16 %v1917_v0, %v552_v48 }
 0x15e   : > { %v549_v38 = vpack.c.bf16 %v537_v36, %v534_v32 }
 0x160   : > { %917 = vmatpush1.bf16.msra.mxu0 %v1713_v35  ;;  %v555_v47 = vmax.bf16 %v1917_v0, %v549_v38 }
 0x161   : > { %918 = vmatprep.subr.bf16.mxu0 %v1718_v37 }
 0x164   : > { %919 = vmatpush1.bf16.msra.mxu0 %v1716_v39 }
 0x165   : > { %920 = vmatprep.subr.bf16.mxu0 %v1721_v40 }
 0x168   : > { %921 = vmatpush1.bf16.msra.mxu0 %v1719_v41 }
 0x169   : > { %922 = vmatprep.subr.bf16.mxu0 %v1724_v42 }
 0x16c   : > { %923 = vmatpush1.bf16.msra.mxu0 %v1722_v43 }
 0x16d   : > { %924 = vmatprep.subr.bf16.mxu0 %v1727_v44  ;;  %v1471_v44 = vld [vmem:[%s2240_s8] ss:$0 sm:$0xff] }
 0x170   : > { %925 = vmatpush1.bf16.msra.mxu0 %v1725_v45 }
 0x173   : > { %943 = vmatmul.mubr.bf16.vlgmr.msra.gmra.mrb[0].mxu0 %v555_v47 }
 0x174   : > { %952 = vmatprep.mubr.bf16.mxu0 %v1917_v0 }
 0x17b   : > { %953 = vmatmul.mubr.bf16.gmra.mrb[4].mxu0 %v558_v49 }
 0x246   : > { %v944_v61 = vpop.f32.mrb[0].mxu0 }
 0x247   : > { %v946_v63 = vpop.f32.mrb[1].mxu0  ;;  %v1554_v2 = vadd.f32 %v944_v61, %v612_v59 }
 0x248   : > { %v948_v1 = vpop.f32.mrb[2].mxu0  ;;  %v1555_v5 = vadd.f32 %v946_v63, %v616_v62 }
 0x249   : > { %v1556_v3 = vadd.f32 %v948_v1, %v612_v59  ;;  %v950_v4 = vpop.f32.mrb[3].mxu0 }
 0x24a   : > { %v1557_v6 = vadd.f32 %v950_v4, %v616_v62 }
 0x24b   : > { %v961_v7 = vpack.c.bf16 %v1556_v3, %v1554_v2 }
 0x24c   : > { %v962_v8 = vpack.c.bf16 %v1557_v6, %v1555_v5 }
 0x24d   : > { %v965_v11 = vmax.bf16 %v1917_v0, %v961_v7 }
 0x24e   : > { %v954_v9 = vpop.f32.mrb[4].mxu0  ;;  %v966_v10 = vmax.bf16 %v1917_v0, %v962_v8 }
 0x24f   : > { %v1558_v12 = vadd.f32 %v954_v9, %v612_v59  ;;  %v956_v58 = vpop.f32.mrb[5].mxu0 }
 0x250   : > { %v1559_v60 = vadd.f32 %v956_v58, %v616_v62  ;;  %v958_v13 = vpop.f32.mrb[6].mxu0  ;;  %1136 = vmatprep.mubr.bf16.mxu1 %v966_v10 }
 0x251   : > { %v959_v14 = vpop.f32.mrb[7].mxu0  ;;  %1137 = vmatmul.mubr.bf16.vlgmr.msra.gmra.mrb[12].mxu1 %v965_v11  ;;  %v963_v16 = vpack.c.bf16 %v1558_v12, %v1558_v12 }
 0x252   : > { %v964_v15 = vpack.c.bf16 %v1559_v60, %v1559_v60  ;;  %1535 = vmatpush3.bf16.msra.mxu1 %v1744_v55 }
 0x253   : > { %1536 = vmatprep.subr.bf16.mxu1 %v1745_v57  ;;  %v967_v19 = vmax.bf16 %v1917_v0, %v963_v16 }
 0x254   : > { %v968_v18 = vmax.bf16 %v1917_v0, %v964_v15 }
 0x256   : > { %1144 = vmatprep.mubr.bf16.mxu1 %v968_v18  ;;  %1537 = vmatpush3.bf16.msra.mxu1 %v1745_v57 }
 0x257   : > { %1538 = vmatprep.subr.bf16.mxu1 %v1746_v17 }
 0x259   : > { %1145 = vmatmul.mubr.bf16.gmra.mrb[16].mxu1 %v967_v19 }
 0x25a   : > { %1539 = vmatpush3.bf16.msra.mxu1 %v1746_v17 }
 0x25b   : > { %1540 = vmatprep.subr.bf16.mxu1 %v1747_v20 }
 0x25e   : > { %1541 = vmatpush3.bf16.msra.mxu1 %v1747_v20 }
 0x25f   : > { %1542 = vmatprep.subr.bf16.mxu1 %v1748_v21 }
 0x262   : > { %1543 = vmatpush3.bf16.msra.mxu1 %v1748_v21 }
 0x263   : > { %1544 = vmatprep.subr.bf16.mxu1 %v1749_v22 }
 0x266   : > { %1545 = vmatpush3.bf16.msra.mxu1 %v1749_v22 }
 0x267   : > { %1546 = vmatprep.subr.bf16.mxu1 %v1750_v23 }
 0x26a   : > { %1547 = vmatpush3.bf16.msra.mxu1 %v1750_v23 }
 0x26b   : > { %1548 = vmatprep.subr.bf16.mxu1 %v1751_v24 }
 0x26e   : > { %1549 = vmatpush3.bf16.msra.mxu1 %v1751_v24 }
 0x324   : > { %v1504_v25 = vpop.f32.mrb[12].mxu1 }
 0x325   : > { %v1505_v26 = vpop.f32.mrb[13].mxu1 }
 0x326   : > { %v1506_v27 = vadd.f32 %v1505_v26, %v1504_v25  ;;  %v1507_v28 = vpop.f32.mrb[14].mxu1 }
 0x327   : > { %v1508_v30 = vpop.f32.mrb[15].mxu1 }
 0x328   : > { %v1509_v31 = vadd.f32 %v1508_v30, %v1507_v28  ;;  %v1139_v32 = vadd.f32 %v1506_v27, %v1454_v29 }
 0x32a   : > { %v1142_v33 = vadd.f32 %v1509_v31, %v1454_v29 }
 0x32c   : > { %v1152_v34 = vpack.c.bf16 %v1142_v33, %v1139_v32  ;;  %v1510_v35 = vpop.f32.mrb[16].mxu1 }
 0x32d   : > { %v1511_v36 = vpop.f32.mrb[17].mxu1 }
 0x32e   : > { %v1512_v37 = vadd.f32 %v1511_v36, %v1510_v35  ;;  %v1513_v38 = vpop.f32.mrb[18].mxu1  ;;  %v1154_v39 = vmax.bf16 %v1917_v0, %v1152_v34 }
 0x32f   : > { %v1514_v40 = vpop.f32.mrb[19].mxu1 }
 0x330   : > { %v1147_v41 = vadd.f32 %v1512_v37, %v1454_v29  ;;  %1550 = vmatprep.mubr.bf16.mxu1 %v1154_v39 }
 0x332   : > { %v1153_v42 = vpack.c.bf16 %v1147_v41, %v1147_v41 }
 0x334   : > { %v1155_v43 = vmax.bf16 %v1917_v0, %v1153_v42 }
 0x336   : > { %1551 = vmatmul.mubr.bf16.vlgmr.msra.gmra.mrb[20].mxu1 %v1155_v43 }
 0x409   : > { %v1552_v45 = vpop.f32.mrb[20].mxu1 }
 0x40a   : > { %v1270_v46 = vadd.f32 %v1552_v45, %v1471_v44  ;;  %v1261_v47 = vpop.f32.mrb[21].mxu1 }
 0x40b   : > { %v1262_v48 = vadd.f32 %v1471_v44, %v1261_v47  ;;  %v1553_v49 = vpop.f32.mrb[22].mxu1 }
 0x40c   : > { %1277 = vst [vmem:[%s370_s18 + $0x10] sm:$0xff] %v1270_v46  ;;  %v1264_v0 = vpop.f32.mrb[23].mxu1 }
 0x40d   : > { %1275 = vst [vmem:[%s370_s18] sm:$0xff] %v1262_v48  ;;  %v1265_v50 = vadd.f32 %v1471_v44, %v1264_v0 }
 0x40f   : > { %1276 = vst [vmem:[%s370_s18 + $0x8] sm:$0xff] %v1265_v50 }
 0x410   : > { %1849 = shalt.err (!%p1846_p11)
}
 0x411   : > { %s1850_s29 = scalar_lea.hbm %s2189_s17, 384  ;;  %s1854_s27 = scalar_lea.hbm %s2241_s9, 768 }
 0x412   : > { %p1851_p13 = scmp.ne.s32.totalorder %s2189_s17, %s1850_s29  ;;  %p1855_p6 = scmp.lt.u32.totalorder %s2189_s17, %s2241_s9 }
 0x413   : > { %p1856_p9 = scmp.lt.u32.totalorder %s1854_s27, %s1850_s29  ;;  %p1858_p10 = scmp.lt.u32.totalorder %s1850_s29, %s2189_s17 }
 0x414   : > { %p1852_p5 = pnand %p1851_p13, %p2265_p1 }
 0x415   : > { %p1857_p12 = por %p1856_p9, %p1855_p6 }
 0x416   : > { %p1853_p0 = pneg %p1852_p5 }
 0x417   : > { %p1859_p2 = por %p1858_p10, %p1857_p12 }
 0x419   : > { %p1860_p3 = pnand %p1859_p2, %p1853_p0 }
 0x41b   : > { %1863 = shalt.err (!%p1860_p3)
}
 0x41c   : > { %s1919_s11 = smov 128   ;;  %s1920_s15 = smov 8  }
 0x41d   : > { %1581 = dma.vmem_to_hbm [thread:$0]  (%p2265_p1), %s2184_s3, 384, %s2189_s17, %s2191_s13, %s1919_s11, %s1919_s11, %s1920_s15  }
 0x41e PF: > { %s2266_s18 = sld [smem:[#allocation15_spill]]  ;;  %p1603_p4 = scmp.ge.s32.totalorder %s1906_s12, 2 }
 0x41f   : > { %s1307_s24 = sand.u32 1, %s1894_s30  }
 0x420   : > { %s1308_s21 = scalar_lea.sflag [#allocation4], %s1307_s24 }
 0x424   : > { %p2267_p7 = scmp.ne.s32.totalorder %s2266_s18, 0 }
 0x426   : > { %p1594_p8 = pnand %p1603_p4, %p2267_p7 }
 0x428   : > { %1889 = dma.done.wait (!%p1594_p8), %s1308_s21, 384  }
 0x429   : > { %1891 = vsyncadd (!%p1594_p8), %s1308_s21, 4294966912  ;;  %s2268_s12 = sld [smem:[#allocation13_spill]]  ;;  %s2269_s20 = sld [smem:[#allocation12_spill]] }
 0x42a   : > { %s2270_s11 = sld [smem:[#allocation14_spill]]  ;;  %s2271_s30 = smov %s1898_s10 }
 0x42f   : > { %p21_p11 = scmp.ge.s32.totalorder %s2268_s12, 4   ;;  %s2272_s10 = smov %s2269_s20 }
 0x431   :  { %23 = sbr.rel (!%p21_p11) target bundleno = 7 (0x7), region = 104 }
 0x438   :  { %1313 = vsyncpa [#allocation3], 1 }
 0x439   :  { %1315 = vsyncpa [#allocation3 + $0x1], 1 }
 0x43a   :  { %1316 = vsyncpa [#allocation6], 1 }
 0x43b   :  { %1317 = vsyncpa [#allocation4], 1 }
 0x43c   :  { %1319 = vsyncpa [#allocation4 + $0x1], 1 }

// kernel: tpu_custom_call.1
= control target key start
LH: loop header
LB: loop body
LE: loop exit
PB: predicated region body
PF: predicated region fallthrough
CT: control target
= control target key end

     0   :  { %s2232_s0 = inlined_call_operand.vmem [shape: f32[48,32], index: 0, kind: input, shape index: {}]   ;;  %s2233_s1 = inlined_call_operand.hbm [shape: bf16[32,384], index: 1, kind: input, shape index: {}]   ;;  %s2234_s2 = inlined_call_operand.vmem [shape: f32[1,384], index: 2, kind: input, shape index: {}]   ;;  %s2235_s3 = inlined_call_operand.hbm [shape: bf16[384,256], index: 3, kind: input, shape index: {}]   ;;  %s2236_s4 = inlined_call_operand.vmem [shape: f32[1,256], index: 4, kind: input, shape index: {}]   ;;  %s2237_s5 = inlined_call_operand.hbm [shape: bf16[256,128], index: 5, kind: input, shape index: {}]   ;;  %s2238_s6 = inlined_call_operand.vmem [shape: f32[1,128], index: 6, kind: input, shape index: {}]   ;;  %s2239_s7 = inlined_call_operand.vmem [shape: bf16[128,128], index: 7, kind: input, shape index: {}]   ;;  %s2240_s8 = inlined_call_operand.vmem [shape: f32[1,128], index: 8, kind: input, shape index: {}]   ;;  %s2241_s9 = inlined_call_operand.hbm [shape: f32[48,128], index: 9, kind: output, shape index: {}]  }
   0x1   :  { %2249 = sst [smem:[#allocation16_spill]] %s2235_s3 }
   0x2   :  { %14 = vsyncpa [#allocation3], 0 }
   0x3   :  { %15 = vsyncpa [#allocation6], 0 }
   0x4   :  { %16 = vsyncpa [#allocation4], 0 }
   0x5   :  { %18 = vsyncpa [#allocation4 + $0x1], 0  ;;  %s1971_s30 = smov 0   ;;  %s1973_s10 = smov 0  }
   0x6   :  { %s1975_s11 = smov 0   ;;  %s1977_s12 = smov 0  }
   0x7 LB: > { %2250 = sst [smem:[#allocation12_spill]] %s1902_s11  ;;  %s1992_s13 = sadd.s32 4294967295, %s1906_s12   ;;  %s1906_s12 = sphi %s1977_s12, %s2268_s12   ;;  %s1902_s11 = sphi %s1975_s11, %s2270_s11   ;;  %s1898_s10 = sphi %s1973_s10, %s2272_s10   ;;  %s1894_s30 = sphi %s1971_s30, %s2271_s30  }
   0x8   : > { %s1385_s14 = sadd.s32 4294967294, %s1906_s12   ;;  %s1996_s15 = sadd.s32 1, %s1906_s12  }
   0x9   : > { %2251 = sst [smem:[#allocation13_spill]] %s1996_s15  ;;  %s225_s16 = sadd.s32 1, %s1902_s11 }
   0xa   : > { %s222_s17 = ssub.s32 %s1906_s12, %s1996_s15  ;;  %p235_p0 = scmp.ne.s32.totalorder %s1902_s11, %s1898_s10 }
   0xb   : > { %p223_p1 = scmp.eq.s32.totalorder %s222_s17, 0  ;;  %p236_p2 = scmp.eq.s32.totalorder %s1992_s13, 1 }
   0xc   : > { %p241_p3 = scmp.ne.s32.totalorder %s1898_s10, %s1894_s30  ;;  %p242_p4 = scmp.eq.s32.totalorder %s1385_s14, 1 }
   0xd   : > { %s2007_s18 = scalar_select %p223_p1, %s1902_s11, %s225_s16  }
   0xe   : > { %p2009_p5 = por %p236_p2, %p235_p0  ;;  %p2013_p6 = por %p242_p4, %p241_p3 }
   0xf   : > { %2252 = sst [smem:[#allocation14_spill]] %s2007_s18  ;;  %p1386_p7 = scmp.ge.s32.totalorder %s1906_s12, 1 }
  0x10   : > { %s2253_s19 = scalar_select %p2009_p5, 1, 0 }
  0x11   : > { %s2254_s20 = scalar_select %p2013_p6, 1, 0 }
  0x12   : > { %p249_p8 = scmp.lt.s32.totalorder %s1906_s12, 3  ;;  %p2242_p9 = scmp.eq.s32.totalorder %s1992_s13, 0 }
  0x13   : > { %2255 = sst [smem:[#allocation15_spill]] %s2254_s20  ;;  %s1908_s22 = smov [#allocation5]  }
  0x14   : > { %p2020_p10 = pnand %p1386_p7, %p249_p8  ;;  %s277_s23 = sshll.u32 %s1908_s22, 4  ;;  %s278_s23 = int_to_ptr.vmem [resolvable:$true] %s277_s23 }
  0x15   : > { %s1909_s25 = smov [#allocation2]   ;;  %s2258_s3 = sld [smem:[#allocation16_spill]] }
  0x16   : > { %s2256_s21 = scalar_select %p2020_p10, 1, 0 }
  0x17   : > { %p1583_p11 = pneg %p2020_p10  ;;  %s261_s26 = sshll.u32 %s1909_s25, 4  ;;  %s2032_s26 = int_to_ptr.vmem [resolvable:$true] %s261_s26 }
  0x19   : > { %p2028_p12 = pnand %p2242_p9, %p1583_p11 }
  0x1b   : > { %s1752_s29 = scalar_lea.hbm %s2258_s3, 6144  ;;  %p2042_p0 = pneg %p2028_p12 }
  0x1c   : > { %p1753_p13 = scmp.ne.s32.totalorder %s2258_s3, %s1752_s29  ;;  %p1759_p3 = scmp.lt.u32.totalorder %s1752_s29, %s2258_s3 }
  0x1e   : > { %p1755_p1 = pnand %p2042_p0, %p1753_p13 }
  0x20   : > { %p1756_p2 = pneg %p1755_p1 }
  0x22   : > { %p1761_p4 = pnand %p1759_p3, %p1756_p2 }
  0x24   : > { %1764 = shalt.err (!%p1761_p4)
}
  0x25   : > { %s1765_s27 = scalar_lea.vmem %s278_s23, 6144  ;;  %p1773_p9 = scmp.lt.s32.totalorder %s278_s23, %s278_s23 }
  0x26   : > { %p1766_p7 = scmp.ne.s32.totalorder %s278_s23, %s1765_s27  ;;  %p1774_p6 = scmp.lt.s32.totalorder %s1765_s27, %s1765_s27 }
  0x28   : > { %p1768_p8 = pnand %p1766_p7, %p2042_p0  ;;  %p1775_p5 = por %p1774_p6, %p1773_p9 }
  0x2a   : > { %p1769_p11 = pneg %p1768_p8 }
  0x2c   : > { %p1776_p10 = pnand %p1775_p5, %p1769_p11 }
  0x2e   : > { %1779 = shalt.err (!%p1776_p10)
}
  0x2f   : > { %s1910_s28 = smov 128   ;;  %s1911_s14 = smov 8  }
  0x30   : > { %1589 = dma.hbm_to_vmem [thread:$0]  (!%p2028_p12), %s2258_s3, 6144, %s278_s23, [#allocation6], %s1910_s28, %s1910_s28, %s1911_s14  }
  0x31   : > { %s1780_s18 = scalar_lea.hbm %s2233_s1, 768 }
  0x32   : > { %p1781_p13 = scmp.ne.s32.totalorder %s2233_s1, %s1780_s18  ;;  %p1787_p9 = scmp.lt.u32.totalorder %s1780_s18, %s2233_s1 }
  0x34   : > { %p1783_p5 = pnand %p1781_p13, %p2042_p0 }
  0x36   : > { %p1784_p6 = pneg %p1783_p5 }
  0x38   : > { %p1789_p10 = pnand %p1787_p9, %p1784_p6 }
  0x3a   : > { %1792 = shalt.err (!%p1789_p10)
}
  0x3b   : > { %s1793_s23 = scalar_lea.vmem %s2032_s26, 768  ;;  %p1801_p4 = scmp.lt.s32.totalorder %s2032_s26, %s2032_s26 }
  0x3c   : > { %p1794_p1 = scmp.ne.s32.totalorder %s2032_s26, %s1793_s23  ;;  %p1802_p7 = scmp.lt.s32.totalorder %s1793_s23, %s1793_s23 }
  0x3e   : > { %p1796_p2 = pnand %p1794_p1, %p2042_p0  ;;  %p1803_p8 = por %p1802_p7, %p1801_p4 }
  0x40   : > { %p1797_p3 = pneg %p1796_p2 }
  0x42   : > { %p1804_p11 = pnand %p1803_p8, %p1797_p3 }
  0x44   : > { %1807 = shalt.err (!%p1804_p11)
}
  0x45   : > { %s1912_s11 = smov 192   ;;  %s1913_s15 = smov 12  }
  0x46   : > { %1586 = dma.hbm_to_vmem [thread:$0]  (!%p2028_p12), %s2233_s1, 768, %s2032_s26, [#allocation3], %s1912_s11, %s1912_s11, %s1913_s15  }
  0x47   : > { %s1914_s28 = smov [#allocation7]   ;;  %s1808_s22 = scalar_lea.hbm %s2237_s5, 2048 }
  0x48   : > { %s293_s14 = sshll.u32 %s1914_s28, 4  ;;  %p1809_p13 = scmp.ne.s32.totalorder %s2237_s5, %s1808_s22  ;;  %s294_s14 = int_to_ptr.vmem [resolvable:$true] %s293_s14 }
  0x49   : > { %p1815_p9 = scmp.lt.u32.totalorder %s1808_s22, %s2237_s5 }
  0x4a   : > { %p1811_p5 = pnand %p1809_p13, %p2042_p0 }
  0x4c   : > { %p1812_p6 = pneg %p1811_p5 }
  0x4e   : > { %p1817_p10 = pnand %p1815_p9, %p1812_p6 }
  0x50   : > { %1820 = shalt.err (!%p1817_p10)
}
  0x51   : > { %s1821_s26 = scalar_lea.vmem %s294_s14, 2048  ;;  %p1829_p4 = scmp.lt.s32.totalorder %s294_s14, %s294_s14 }
  0x52   : > { %p1822_p1 = scmp.ne.s32.totalorder %s294_s14, %s1821_s26  ;;  %p1830_p7 = scmp.lt.s32.totalorder %s1821_s26, %s1821_s26 }
  0x54   : > { %p1824_p2 = pnand %p1822_p1, %p2042_p0  ;;  %p1831_p8 = por %p1830_p7, %p1829_p4 }
  0x56   : > { %p1825_p3 = pneg %p1824_p2 }
  0x58   : > { %p1832_p11 = pnand %p1831_p8, %p1825_p3 }
  0x5a   : > { %1835 = shalt.err (!%p1832_p11)
}
  0x5b   : > { %s1915_s11 = smov 64   ;;  %s1916_s15 = smov 4  }
  0x5c   : > { %1592 = dma.hbm_to_vmem [thread:$0]  (!%p2028_p12), %s2237_s5, 2048, %s294_s14, [#allocation6], %s1915_s11, %s1915_s11, %s1916_s15  }
  0x5d   : > { %p2260_p13 = scmp.ne.s32.totalorder %s2256_s21, 0 }
  0x5e   : > { %p2261_p5 = scmp.eq.s32.totalorder (!%p2260_p13), %s1992_s13, 0 }
  0x5f   : > { %327 = sbr.rel (%p2260_p13) target bundleno = 1054 (0x41e), region = 56 }
  0x66   : > { %1881 = dma.done.wait (%p2261_p5), [#allocation3], 768   ;;  %p2262_p0 = pmov %p2261_p5 }
  0x68   : > { %1883 = vsyncadd (%p2262_p0), [#allocation3], 4294966528  ;;  %p2263_p6 = pmov %p2262_p0 }
  0x69   : > { %p2264_p9 = pmov %p2262_p0 }
  0x6a   : > { %1885 = dma.done.wait (%p2263_p6), [#allocation6], 8192  }
  0x6b   : > { %1887 = vsyncadd (%p2264_p9), [#allocation6], 4294959104  ;;  %s371_s24 = smul.u32 3, %s1992_s13  ;;  %v1917_v0 = vmov 0   ;;  %v1648_v1 = vld [vmem:[#allocation2 + $0x4] ss:$12 sps:$4 sm:$0xff]   ;;  %v394_v56 = vlaneseq }
  0x6c   : > { %480 = vmatprep.mubr.bf16.mxu1 %v1917_v0  ;;  %v1650_v2 = vld [vmem:[#allocation2] ss:$12 sps:$4 sm:$0xff]   ;;  %448 = vmatprep.subr.bf16.mxu1 %v1648_v1  ;;  %v1651_v3 = vld [vmem:[#allocation2 + $0x1c] ss:$12 sps:$4 sm:$0xff]   ;;  %v1653_v4 = vld [vmem:[#allocation2 + $0x18] ss:$12 sps:$4 sm:$0xff]  }
  0x6d   : > { %p372_p12 = scmp.lt.s32.totalorder %s371_s24, 5  ;;  %449 = vmatpush1.bf16.msra.mxu1 %v1650_v2  ;;  %v1654_v7 = vld [vmem:[#allocation2 + $0x8] ss:$12 sps:$4 sm:$0xff]   ;;  %v1658_v10 = vld [vmem:[#allocation5] ss:$8 sps:$4 sm:$0xff]   ;;  %vm441_vm0 = vcmask 261120  }
  0x6e   : > { %450 = vmatprep.subr.bf16.mxu1 %v1651_v3  ;;  %v1656_v9 = vld [vmem:[#allocation5 + $0x4] ss:$8 sps:$4 sm:$0xff]   ;;  %v1659_v11 = vld [vmem:[#allocation5 + $0x14] ss:$8 sps:$4 sm:$0xff]   ;;  %v1661_v13 = vld [vmem:[#allocation5 + $0x10] ss:$8 sps:$4 sm:$0xff]  }
  0x6f   : > { %s2274_s24 = smov (!%p372_p12, %s371_s24), 5  ;;  %v1655_v12 = vld [vmem:[#allocation2 + $0x20] ss:$12 sps:$4 sm:$0xff]   ;;  %859 = vmatprep.subr.bf16.mxu0 %v1656_v9  ;;  %v1662_v14 = vld [vmem:[#allocation5 + $0x24] ss:$8 sps:$4 sm:$0xff]   ;;  %v2119_v57 = vshrl.u32 %v394_v56, 7 }
  0x70   : > { %s1395_s21 = sshll.u32 %s2274_s24, 3  ;;  %860 = vmatpush1.bf16.msra.mxu0 %v1658_v10  ;;  %v1664_v16 = vld [vmem:[#allocation5 + $0x20] ss:$8 sps:$4 sm:$0xff]   ;;  %v1665_v18 = vld [vmem:[#allocation5 + $0x34] ss:$8 sps:$4 sm:$0xff]   ;;  %s368_s27 = sand.u32 1, %s1898_s10  }
  0x71   : > { %s375_s28 = scalar_lea.vmem %s2232_s0, %s1395_s21  ;;  %451 = vmatpush1.bf16.msra.mxu1 %v1653_v4  ;;  %861 = vmatprep.subr.bf16.mxu0 %v1659_v11  ;;  %v1667_v19 = vld [vmem:[#allocation5 + $0x30] ss:$8 sps:$4 sm:$0xff]   ;;  %v1668_v20 = vld [vmem:[#allocation5 + $0x44] ss:$8 sps:$4 sm:$0xff]   ;;  %v1670_v21 = vld [vmem:[#allocation5 + $0x40] ss:$8 sps:$4 sm:$0xff]  }
  0x72   : > { %v379_v5 = vld [vmem:[%s375_s28] sm:$0xff]  ;;  %v380_v6 = vld [vmem:[%s375_s28 + $0x8] sm:$0xff]  ;;  %1526 = vmatprep.subr.bf16.mxu1 %v1654_v7  ;;  %v381_v15 = vld [vmem:[%s375_s28 + $0x10] sm:$0xff]  ;;  %v396_v58 = vsub.s32 0, %v2119_v57  ;;  %v400_v60 = vsub.s32 1, %v2119_v57  ;;  %s1568_s23 = smul.u32 24, %s368_s27 }
  0x73   : > { %v382_v8 = vpack.c.bf16 %v380_v6, %v379_v5  ;;  %v383_v17 = vpack.c.bf16 %v381_v15, %v381_v15  ;;  %v1671_v22 = vld [vmem:[#allocation5 + $0x54] ss:$8 sps:$4 sm:$0xff]   ;;  %v1673_v23 = vld [vmem:[#allocation5 + $0x50] ss:$8 sps:$4 sm:$0xff]   ;;  %v1674_v24 = vld [vmem:[#allocation5 + $0x64] ss:$8 sps:$4 sm:$0xff]  }
  0x74   : > { %862 = vmatpush1.bf16.msra.mxu0 %v1661_v13  ;;  %v1676_v25 = vld [vmem:[#allocation5 + $0x60] ss:$8 sps:$4 sm:$0xff]   ;;  %v1677_v26 = vld [vmem:[#allocation5 + $0x74] ss:$8 sps:$4 sm:$0xff]   ;;  %v1679_v27 = vld [vmem:[#allocation5 + $0x70] ss:$8 sps:$4 sm:$0xff]  }
  0x75   : > { %1402 = vmatmul.mubr.msk.bf16.vlgmr.msra.gmra.mrb[0].mxu1 %vm441_vm0, %v382_v8  ;;  %863 = vmatprep.subr.bf16.mxu0 %v1662_v14  ;;  %v1680_v28 = vld [vmem:[#allocation5 + $0x84] ss:$8 sps:$4 sm:$0xff]   ;;  %v1682_v29 = vld [vmem:[#allocation5 + $0x80] ss:$8 sps:$4 sm:$0xff]   ;;  %v1683_v30 = vld [vmem:[#allocation5 + $0x94] ss:$8 sps:$4 sm:$0xff]  }
  0x76   : > { %1527 = vmatpush3.bf16.msra.mxu1 %v1654_v7  ;;  %490 = vmatprep.mubr.bf16.mxu1 %v1917_v0  ;;  %v1685_v31 = vld [vmem:[#allocation5 + $0x90] ss:$8 sps:$4 sm:$0xff]   ;;  %v1686_v32 = vld [vmem:[#allocation5 + $0xa4] ss:$8 sps:$4 sm:$0xff]   ;;  %v1688_v33 = vld [vmem:[#allocation5 + $0xa0] ss:$8 sps:$4 sm:$0xff]  }
  0x77   : > { %1528 = vmatprep.subr.bf16.mxu1 %v1655_v12  ;;  %v1689_v34 = vld [vmem:[#allocation5 + $0xb4] ss:$8 sps:$4 sm:$0xff]   ;;  %v1691_v35 = vld [vmem:[#allocation5 + $0xb0] ss:$8 sps:$4 sm:$0xff]   ;;  %v1692_v36 = vld [vmem:[#allocation5 + $0xc4] ss:$8 sps:$4 sm:$0xff]  }
  0x78   : > { %864 = vmatpush1.bf16.msra.mxu0 %v1664_v16  ;;  %v1694_v37 = vld [vmem:[#allocation5 + $0xc0] ss:$8 sps:$4 sm:$0xff]   ;;  %v1695_v38 = vld [vmem:[#allocation5 + $0xd4] ss:$8 sps:$4 sm:$0xff]   ;;  %v1697_v39 = vld [vmem:[#allocation5 + $0xd0] ss:$8 sps:$4 sm:$0xff]  }
  0x79   : > { %865 = vmatprep.subr.bf16.mxu0 %v1665_v18  ;;  %v1698_v40 = vld [vmem:[#allocation5 + $0xe4] ss:$8 sps:$4 sm:$0xff]   ;;  %v1700_v41 = vld [vmem:[#allocation5 + $0xe0] ss:$8 sps:$4 sm:$0xff]   ;;  %v1701_v42 = vld [vmem:[#allocation5 + $0xf4] ss:$8 sps:$4 sm:$0xff]  }
  0x7a   : > { %1529 = vmatpush3.bf16.msra.mxu1 %v1655_v12  ;;  %v1703_v43 = vld [vmem:[#allocation5 + $0xf0] ss:$8 sps:$4 sm:$0xff]   ;;  %v1706_v44 = vld [vmem:[#allocation5 + $0x104] ss:$8 sps:$4 sm:$0xff]   ;;  %v392_v59 = vld [vmem:[%s2234_s2] sm:$0x7] }
  0x7b   : > { %v1728_v45 = vld [vmem:[#allocation7 + $0x40] sm:$0xff]   ;;  %v1730_v47 = vld [vmem:[#allocation7 + $0x48] sm:$0xff]   ;;  %v1732_v49 = vld [vmem:[#allocation7 + $0x50] sm:$0xff]   ;;  %v397_v61 = vrot.slane %v392_v59, %v396_v58  ;;  %v401_v63 = vrot.slane %v392_v59, %v400_v60  ;;  %s1483_s15 = smul.u32 384, %s1992_s13  ;;  %s370_s18 = scalar_lea.vmem [#allocation8], %s1568_s23 }
  0x7c   : > { %866 = vmatpush1.bf16.msra.mxu0 %v1667_v19  ;;  %v1729_v46 = vld [vmem:[#allocation7] sm:$0xff]   ;;  %1488 = vmatprep.subr.bf16.mxu1 %v1728_v45  ;;  %v1731_v48 = vld [vmem:[#allocation7 + $0x8] sm:$0xff]   ;;  %v1733_v50 = vld [vmem:[#allocation7 + $0x10] sm:$0xff]   ;;  %v404_v19 = vsub.s32 2, %v2119_v57  ;;  %s1292_s3 = sshll.u32 %s370_s18, 4  ;;  %s2191_s13 = scalar_lea.sflag [#allocation4], %s368_s27  ;;  %s2184_s3 = int_to_ptr.vmem [resolvable:$true] %s1292_s3 }
  0x7d   : > { %1403 = vmatmul.mubr.msk.bf16.gmra.mrb[4].mxu1 %vm441_vm0, %v383_v17  ;;  %867 = vmatprep.subr.bf16.mxu0 %v1668_v20  ;;  %v1734_v51 = vld [vmem:[#allocation7 + $0x58] sm:$0xff]   ;;  %v1736_v53 = vld [vmem:[#allocation7 + $0x60] sm:$0xff]   ;;  %v1738_v55 = vld [vmem:[#allocation7 + $0x68] sm:$0xff]   ;;  %s2189_s17 = scalar_lea.hbm %s2241_s9, %s1483_s15  ;;  %s1836_s20 = scalar_lea.vmem %s2184_s3, 384 }
  0x7e   : > { %1530 = vmatprep.mubr.msk.bf16.mxu1 %vm441_vm0, %v382_v8  ;;  %v1735_v52 = vld [vmem:[#allocation7 + $0x18] sm:$0xff]   ;;  %v1737_v54 = vld [vmem:[#allocation7 + $0x20] sm:$0xff]   ;;  %v1745_v57 = vld [vmem:[%s2239_s7 + $0x8] sm:$0xff]   ;;  %p1837_p10 = scmp.ne.s32.totalorder %s2184_s3, %s1836_s20  ;;  %p2265_p1 = scmp.ne.s32.totalorder %s2253_s19, 0 }
  0x7f   : > { %v1704_v11 = vld [vmem:[#allocation5 + $0x100] ss:$8 sps:$4 sm:$0xff]   ;;  %v1709_v14 = vld [vmem:[#allocation5 + $0x114] ss:$8 sps:$4 sm:$0xff]   ;;  %v1725_v45 = vld [vmem:[#allocation5 + $0x170] ss:$8 sps:$4 sm:$0xff]  }
  0x80   : > { %868 = vmatpush1.bf16.msra.mxu0 %v1670_v21  ;;  %v607_v56 = vld [vmem:[%s2236_s4] sm:$0x3]  ;;  %p1838_p2 = pnand %p1837_p10, %p2265_p1  ;;  %s1918_s28 = smov [#allocation8]  }
  0x81   : > { %869 = vmatprep.subr.bf16.mxu0 %v1671_v22  ;;  %v1707_v22 = vld [vmem:[#allocation5 + $0x110] ss:$8 sps:$4 sm:$0xff]   ;;  %s1840_s14 = sshll.u32 %s1918_s28, 4  ;;  %s1841_s14 = int_to_ptr.vmem [resolvable:$false] %s1840_s14 }
  0x82   : > { %p1839_p3 = pneg %p1838_p2  ;;  %s1842_s16 = scalar_lea.vmem %s1841_s14, 768 }
  0x83   : > { %p1843_p4 = scmp.lt.s32.totalorder %s2184_s3, %s1841_s14  ;;  %p1844_p7 = scmp.lt.s32.totalorder %s1842_s16, %s1836_s20 }
  0x84   : > { %870 = vmatpush1.bf16.msra.mxu0 %v1673_v23 }
  0x85   : > { %1531 = vmatmul.mubr.msk.bf16.vlgmr.msra.gmra.mrb[8].mxu1 %vm441_vm0, %v383_v17  ;;  %871 = vmatprep.subr.bf16.mxu0 %v1674_v24  ;;  %v1712_v24 = vld [vmem:[#allocation5 + $0x124] ss:$8 sps:$4 sm:$0xff]   ;;  %p1845_p8 = por %p1844_p7, %p1843_p4 }
  0x86   : > { %1489 = vmatpush3.bf16.msra.mxu1 %v1729_v46 }
  0x87   : > { %1490 = vmatprep.subr.bf16.mxu1 %v1730_v47  ;;  %p1846_p11 = pnand %p1845_p8, %p1839_p3 }
  0x88   : > { %872 = vmatpush1.bf16.msra.mxu0 %v1676_v25 }
  0x89   : > { %873 = vmatprep.subr.bf16.mxu0 %v1677_v26  ;;  %v405_v26 = vrot.slane %v392_v59, %v404_v19  ;;  %v612_v59 = vrot.slane %v607_v56, %v396_v58 }
  0x8a   : > { %1491 = vmatpush3.bf16.msra.mxu1 %v1731_v48 }
  0x8b   : > { %1492 = vmatprep.subr.bf16.mxu1 %v1732_v49 }
  0x8c   : > { %874 = vmatpush1.bf16.msra.mxu0 %v1679_v27 }
  0x8d   : > { %875 = vmatprep.subr.bf16.mxu0 %v1680_v28  ;;  %v1710_v28 = vld [vmem:[#allocation5 + $0x120] ss:$8 sps:$4 sm:$0xff]  }
  0x8e   : > { %1493 = vmatpush3.bf16.msra.mxu1 %v1733_v50  ;;  %v1739_v50 = vld [vmem:[#allocation7 + $0x28] sm:$0xff]  }
  0x8f   : > { %1494 = vmatprep.subr.bf16.mxu1 %v1734_v51  ;;  %v1740_v51 = vld [vmem:[#allocation7 + $0x70] sm:$0xff]  }
  0x90   : > { %876 = vmatpush1.bf16.msra.mxu0 %v1682_v29 }
  0x91   : > { %877 = vmatprep.subr.bf16.mxu0 %v1683_v30  ;;  %v1715_v30 = vld [vmem:[#allocation5 + $0x134] ss:$8 sps:$4 sm:$0xff]  }
  0x92   : > { %1495 = vmatpush3.bf16.msra.mxu1 %v1735_v52  ;;  %v1741_v52 = vld [vmem:[#allocation7 + $0x30] sm:$0xff]  }
  0x93   : > { %1496 = vmatprep.subr.bf16.mxu1 %v1736_v53  ;;  %v1742_v53 = vld [vmem:[#allocation7 + $0x78] sm:$0xff]  }
  0x94   : > { %878 = vmatpush1.bf16.msra.mxu0 %v1685_v31 }
  0x95   : > { %879 = vmatprep.subr.bf16.mxu0 %v1686_v32 }
  0x96   : > { %1497 = vmatpush3.bf16.msra.mxu1 %v1737_v54  ;;  %v1743_v54 = vld [vmem:[#allocation7 + $0x38] sm:$0xff]  }
  0x97   : > { %1498 = vmatprep.subr.bf16.mxu1 %v1738_v55  ;;  %v1744_v55 = vld [vmem:[%s2239_s7] sm:$0xff]  }
  0x98   : > { %880 = vmatpush1.bf16.msra.mxu0 %v1688_v33 }
  0x99   : > { %881 = vmatprep.subr.bf16.mxu0 %v1689_v34 }
  0x9a   : > { %1499 = vmatpush3.bf16.msra.mxu1 %v1739_v50 }
  0x9b   : > { %1500 = vmatprep.subr.bf16.mxu1 %v1740_v51 }
  0x9c   : > { %882 = vmatpush1.bf16.msra.mxu0 %v1691_v35  ;;  %v1713_v35 = vld [vmem:[#allocation5 + $0x130] ss:$8 sps:$4 sm:$0xff]  }
  0x9d   : > { %883 = vmatprep.subr.bf16.mxu0 %v1692_v36 }
  0x9e   : > { %1501 = vmatpush3.bf16.msra.mxu1 %v1741_v52 }
  0x9f   : > { %1502 = vmatprep.subr.bf16.mxu1 %v1742_v53 }
  0xa0   : > { %884 = vmatpush1.bf16.msra.mxu0 %v1694_v37  ;;  %v1718_v37 = vld [vmem:[#allocation5 + $0x144] ss:$8 sps:$4 sm:$0xff]  }
  0xa1   : > { %885 = vmatprep.subr.bf16.mxu0 %v1695_v38 }
  0xa2   : > { %1503 = vmatpush3.bf16.msra.mxu1 %v1743_v54 }
  0xa3   : > { %1534 = vmatprep.subr.bf16.mxu1 %v1744_v55 }
  0xa4   : > { %886 = vmatpush1.bf16.msra.mxu0 %v1697_v39  ;;  %v1716_v39 = vld [vmem:[#allocation5 + $0x140] ss:$8 sps:$4 sm:$0xff]  }
  0xa5   : > { %887 = vmatprep.subr.bf16.mxu0 %v1698_v40  ;;  %v1721_v40 = vld [vmem:[#allocation5 + $0x154] ss:$8 sps:$4 sm:$0xff]  }
  0xa8   : > { %888 = vmatpush1.bf16.msra.mxu0 %v1700_v41  ;;  %v1719_v41 = vld [vmem:[#allocation5 + $0x150] ss:$8 sps:$4 sm:$0xff]  }
  0xa9   : > { %889 = vmatprep.subr.bf16.mxu0 %v1701_v42  ;;  %v1724_v42 = vld [vmem:[#allocation5 + $0x164] ss:$8 sps:$4 sm:$0xff]  }
  0xac   : > { %890 = vmatpush1.bf16.msra.mxu0 %v1703_v43  ;;  %v1722_v43 = vld [vmem:[#allocation5 + $0x160] ss:$8 sps:$4 sm:$0xff]  }
  0xad   : > { %910 = vmatprep.subr.bf16.mxu0 %v1706_v44  ;;  %v1727_v44 = vld [vmem:[#allocation5 + $0x174] ss:$8 sps:$4 sm:$0xff]  }
 0x148   : > { %v482_v62 = vpop.f32.mrb[0].mxu1 }
 0x149   : > { %v484_v1 = vpop.f32.mrb[1].mxu1  ;;  %v483_v3 = vadd.f32 %v482_v62, %v397_v61  ;;  %v616_v62 = vrot.slane %v607_v56, %v400_v60 }
 0x14a   : > { %v486_v2 = vpop.f32.mrb[2].mxu1  ;;  %v485_v6 = vadd.f32 %v484_v1, %v401_v63 }
 0x14b   : > { %v487_v4 = vadd.f32 %v486_v2, %v397_v61  ;;  %v488_v5 = vpop.f32.mrb[3].mxu1 }
 0x14c   : > { %v489_v7 = vadd.f32 %v488_v5, %v401_v63 }
 0x14d   : > { %v547_v8 = vpack.c.bf16 %v487_v4, %v483_v3 }
 0x14e   : > { %v548_v9 = vpack.c.bf16 %v489_v7, %v485_v6 }
 0x14f   : > { %v553_v13 = vmax.bf16 %v1917_v0, %v547_v8 }
 0x150   : > { %v554_v10 = vmax.bf16 %v1917_v0, %v548_v9  ;;  %v492_v12 = vpop.f32.mrb[4].mxu1 }
 0x151   : > { %v493_v15 = vadd.f32 %v492_v12, %v397_v61  ;;  %v494_v16 = vpop.f32.mrb[5].mxu1 }
 0x152   : > { %891 = vmatprep.mubr.bf16.mxu0 %v554_v10  ;;  %v495_v17 = vadd.f32 %v494_v16, %v401_v63  ;;  %v496_v18 = vpop.f32.mrb[6].mxu1 }
 0x153   : > { %892 = vmatmul.mubr.bf16.vlgmr.msra.gmra.mrb[0].mxu0 %v553_v13  ;;  %v550_v20 = vpack.c.bf16 %v493_v15, %v493_v15  ;;  %v497_v21 = vpop.f32.mrb[7].mxu1 }
 0x154   : > { %911 = vmatpush1.bf16.msra.mxu0 %v1704_v11  ;;  %v551_v23 = vpack.c.bf16 %v495_v17, %v495_v17  ;;  %v1746_v17 = vld [vmem:[%s2239_s7 + $0x10] sm:$0xff]   ;;  %v1748_v21 = vld [vmem:[%s2239_s7 + $0x20] sm:$0xff]  }
 0x155   : > { %912 = vmatprep.subr.bf16.mxu0 %v1709_v14  ;;  %v556_v27 = vmax.bf16 %v1917_v0, %v550_v20  ;;  %v1747_v20 = vld [vmem:[%s2239_s7 + $0x18] sm:$0xff]  }
 0x156   : > { %v557_v25 = vmax.bf16 %v1917_v0, %v551_v23  ;;  %v1750_v23 = vld [vmem:[%s2239_s7 + $0x30] sm:$0xff]  }
 0x158   : > { %913 = vmatpush1.bf16.msra.mxu0 %v1707_v22  ;;  %v1532_v29 = vpop.f32.mrb[8].mxu1  ;;  %901 = vmatprep.mubr.bf16.mxu0 %v557_v25  ;;  %v1749_v22 = vld [vmem:[%s2239_s7 + $0x28] sm:$0xff]  }
 0x159   : > { %914 = vmatprep.subr.bf16.mxu0 %v1712_v24  ;;  %v533_v31 = vpop.f32.mrb[9].mxu1  ;;  %v542_v46 = vadd.f32 %v1532_v29, %v405_v26  ;;  %v1751_v24 = vld [vmem:[%s2239_s7 + $0x38] sm:$0xff]   ;;  %v1454_v29 = vld [vmem:[%s2238_s6] ss:$0 sm:$0xff] }
 0x15a   : > { %v534_v32 = vadd.f32 %v533_v31, %v405_v26  ;;  %v1533_v33 = vpop.f32.mrb[10].mxu1 }
 0x15b   : > { %902 = vmatmul.mubr.bf16.gmra.mrb[4].mxu0 %v556_v27  ;;  %v536_v34 = vpop.f32.mrb[11].mxu1  ;;  %v552_v48 = vpack.c.bf16 %v542_v46, %v542_v46 }
 0x15c   : > { %915 = vmatpush1.bf16.msra.mxu0 %v1710_v28  ;;  %v537_v36 = vadd.f32 %v536_v34, %v405_v26  ;;  %942 = vmatprep.mubr.bf16.mxu0 %v1917_v0 }
 0x15d   : > { %916 = vmatprep.subr.bf16.mxu0 %v1715_v30  ;;  %v558_v49 = vmax.bf16 %v1917_v0, %v552_v48 }
 0x15e   : > { %v549_v38 = vpack.c.bf16 %v537_v36, %v534_v32 }
 0x160   : > { %917 = vmatpush1.bf16.msra.mxu0 %v1713_v35  ;;  %v555_v47 = vmax.bf16 %v1917_v0, %v549_v38 }
 0x161   : > { %918 = vmatprep.subr.bf16.mxu0 %v1718_v37 }
 0x164   : > { %919 = vmatpush1.bf16.msra.mxu0 %v1716_v39 }
 0x165   : > { %920 = vmatprep.subr.bf16.mxu0 %v1721_v40 }
 0x168   : > { %921 = vmatpush1.bf16.msra.mxu0 %v1719_v41 }
 0x169   : > { %922 = vmatprep.subr.bf16.mxu0 %v1724_v42 }
 0x16c   : > { %923 = vmatpush1.bf16.msra.mxu0 %v1722_v43 }
 0x16d   : > { %924 = vmatprep.subr.bf16.mxu0 %v1727_v44  ;;  %v1471_v44 = vld [vmem:[%s2240_s8] ss:$0 sm:$0xff] }
 0x170   : > { %925 = vmatpush1.bf16.msra.mxu0 %v1725_v45 }
 0x173   : > { %943 = vmatmul.mubr.bf16.vlgmr.msra.gmra.mrb[0].mxu0 %v555_v47 }
 0x174   : > { %952 = vmatprep.mubr.bf16.mxu0 %v1917_v0 }
 0x17b   : > { %953 = vmatmul.mubr.bf16.gmra.mrb[4].mxu0 %v558_v49 }
 0x246   : > { %v944_v61 = vpop.f32.mrb[0].mxu0 }
 0x247   : > { %v946_v63 = vpop.f32.mrb[1].mxu0  ;;  %v1554_v2 = vadd.f32 %v944_v61, %v612_v59 }
 0x248   : > { %v948_v1 = vpop.f32.mrb[2].mxu0  ;;  %v1555_v5 = vadd.f32 %v946_v63, %v616_v62 }
 0x249   : > { %v1556_v3 = vadd.f32 %v948_v1, %v612_v59  ;;  %v950_v4 = vpop.f32.mrb[3].mxu0 }
 0x24a   : > { %v1557_v6 = vadd.f32 %v950_v4, %v616_v62 }
 0x24b   : > { %v961_v7 = vpack.c.bf16 %v1556_v3, %v1554_v2 }
 0x24c   : > { %v962_v8 = vpack.c.bf16 %v1557_v6, %v1555_v5 }
 0x24d   : > { %v965_v11 = vmax.bf16 %v1917_v0, %v961_v7 }
 0x24e   : > { %v954_v9 = vpop.f32.mrb[4].mxu0  ;;  %v966_v10 = vmax.bf16 %v1917_v0, %v962_v8 }
 0x24f   : > { %v1558_v12 = vadd.f32 %v954_v9, %v612_v59  ;;  %v956_v58 = vpop.f32.mrb[5].mxu0 }
 0x250   : > { %v1559_v60 = vadd.f32 %v956_v58, %v616_v62  ;;  %v958_v13 = vpop.f32.mrb[6].mxu0  ;;  %1136 = vmatprep.mubr.bf16.mxu1 %v966_v10 }
 0x251   : > { %v959_v14 = vpop.f32.mrb[7].mxu0  ;;  %1137 = vmatmul.mubr.bf16.vlgmr.msra.gmra.mrb[12].mxu1 %v965_v11  ;;  %v963_v16 = vpack.c.bf16 %v1558_v12, %v1558_v12 }
 0x252   : > { %v964_v15 = vpack.c.bf16 %v1559_v60, %v1559_v60  ;;  %1535 = vmatpush3.bf16.msra.mxu1 %v1744_v55 }
 0x253   : > { %1536 = vmatprep.subr.bf16.mxu1 %v1745_v57  ;;  %v967_v19 = vmax.bf16 %v1917_v0, %v963_v16 }
 0x254   : > { %v968_v18 = vmax.bf16 %v1917_v0, %v964_v15 }
 0x256   : > { %1144 = vmatprep.mubr.bf16.mxu1 %v968_v18  ;;  %1537 = vmatpush3.bf16.msra.mxu1 %v1745_v57 }
 0x257   : > { %1538 = vmatprep.subr.bf16.mxu1 %v1746_v17 }
 0x259   : > { %1145 = vmatmul.mubr.bf16.gmra.mrb[16].mxu1 %v967_v19 }
 0x25a   : > { %1539 = vmatpush3.bf16.msra.mxu1 %v1746_v17 }
 0x25b   : > { %1540 = vmatprep.subr.bf16.mxu1 %v1747_v20 }
 0x25e   : > { %1541 = vmatpush3.bf16.msra.mxu1 %v1747_v20 }
 0x25f   : > { %1542 = vmatprep.subr.bf16.mxu1 %v1748_v21 }
 0x262   : > { %1543 = vmatpush3.bf16.msra.mxu1 %v1748_v21 }
 0x263   : > { %1544 = vmatprep.subr.bf16.mxu1 %v1749_v22 }
 0x266   : > { %1545 = vmatpush3.bf16.msra.mxu1 %v1749_v22 }
 0x267   : > { %1546 = vmatprep.subr.bf16.mxu1 %v1750_v23 }
 0x26a   : > { %1547 = vmatpush3.bf16.msra.mxu1 %v1750_v23 }
 0x26b   : > { %1548 = vmatprep.subr.bf16.mxu1 %v1751_v24 }
 0x26e   : > { %1549 = vmatpush3.bf16.msra.mxu1 %v1751_v24 }
 0x324   : > { %v1504_v25 = vpop.f32.mrb[12].mxu1 }
 0x325   : > { %v1505_v26 = vpop.f32.mrb[13].mxu1 }
 0x326   : > { %v1506_v27 = vadd.f32 %v1505_v26, %v1504_v25  ;;  %v1507_v28 = vpop.f32.mrb[14].mxu1 }
 0x327   : > { %v1508_v30 = vpop.f32.mrb[15].mxu1 }
 0x328   : > { %v1509_v31 = vadd.f32 %v1508_v30, %v1507_v28  ;;  %v1139_v32 = vadd.f32 %v1506_v27, %v1454_v29 }
 0x32a   : > { %v1142_v33 = vadd.f32 %v1509_v31, %v1454_v29 }
 0x32c   : > { %v1152_v34 = vpack.c.bf16 %v1142_v33, %v1139_v32  ;;  %v1510_v35 = vpop.f32.mrb[16].mxu1 }
 0x32d   : > { %v1511_v36 = vpop.f32.mrb[17].mxu1 }
 0x32e   : > { %v1512_v37 = vadd.f32 %v1511_v36, %v1510_v35  ;;  %v1513_v38 = vpop.f32.mrb[18].mxu1  ;;  %v1154_v39 = vmax.bf16 %v1917_v0, %v1152_v34 }
 0x32f   : > { %v1514_v40 = vpop.f32.mrb[19].mxu1 }
 0x330   : > { %v1147_v41 = vadd.f32 %v1512_v37, %v1454_v29  ;;  %1550 = vmatprep.mubr.bf16.mxu1 %v1154_v39 }
 0x332   : > { %v1153_v42 = vpack.c.bf16 %v1147_v41, %v1147_v41 }
 0x334   : > { %v1155_v43 = vmax.bf16 %v1917_v0, %v1153_v42 }
 0x336   : > { %1551 = vmatmul.mubr.bf16.vlgmr.msra.gmra.mrb[20].mxu1 %v1155_v43 }
 0x409   : > { %v1552_v45 = vpop.f32.mrb[20].mxu1 }
 0x40a   : > { %v1270_v46 = vadd.f32 %v1552_v45, %v1471_v44  ;;  %v1261_v47 = vpop.f32.mrb[21].mxu1 }
 0x40b   : > { %v1262_v48 = vadd.f32 %v1471_v44, %v1261_v47  ;;  %v1553_v49 = vpop.f32.mrb[22].mxu1 }
 0x40c   : > { %1277 = vst [vmem:[%s370_s18 + $0x10] sm:$0xff] %v1270_v46  ;;  %v1264_v0 = vpop.f32.mrb[23].mxu1 }
 0x40d   : > { %1275 = vst [vmem:[%s370_s18] sm:$0xff] %v1262_v48  ;;  %v1265_v50 = vadd.f32 %v1471_v44, %v1264_v0 }
 0x40f   : > { %1276 = vst [vmem:[%s370_s18 + $0x8] sm:$0xff] %v1265_v50 }
 0x410   : > { %1849 = shalt.err (!%p1846_p11)
}
 0x411   : > { %s1850_s29 = scalar_lea.hbm %s2189_s17, 384  ;;  %s1854_s27 = scalar_lea.hbm %s2241_s9, 768 }
 0x412   : > { %p1851_p13 = scmp.ne.s32.totalorder %s2189_s17, %s1850_s29  ;;  %p1855_p6 = scmp.lt.u32.totalorder %s2189_s17, %s2241_s9 }
 0x413   : > { %p1856_p9 = scmp.lt.u32.totalorder %s1854_s27, %s1850_s29  ;;  %p1858_p10 = scmp.lt.u32.totalorder %s1850_s29, %s2189_s17 }
 0x414   : > { %p1852_p5 = pnand %p1851_p13, %p2265_p1 }
 0x415   : > { %p1857_p12 = por %p1856_p9, %p1855_p6 }
 0x416   : > { %p1853_p0 = pneg %p1852_p5 }
 0x417   : > { %p1859_p2 = por %p1858_p10, %p1857_p12 }
 0x419   : > { %p1860_p3 = pnand %p1859_p2, %p1853_p0 }
 0x41b   : > { %1863 = shalt.err (!%p1860_p3)
}
 0x41c   : > { %s1919_s11 = smov 128   ;;  %s1920_s15 = smov 8  }
 0x41d   : > { %1581 = dma.vmem_to_hbm [thread:$0]  (%p2265_p1), %s2184_s3, 384, %s2189_s17, %s2191_s13, %s1919_s11, %s1919_s11, %s1920_s15  }
 0x41e PF: > { %s2266_s18 = sld [smem:[#allocation15_spill]]  ;;  %p1603_p4 = scmp.ge.s32.totalorder %s1906_s12, 2 }
 0x41f   : > { %s1307_s24 = sand.u32 1, %s1894_s30  }
 0x420   : > { %s1308_s21 = scalar_lea.sflag [#allocation4], %s1307_s24 }
 0x424   : > { %p2267_p7 = scmp.ne.s32.totalorder %s2266_s18, 0 }
 0x426   : > { %p1594_p8 = pnand %p1603_p4, %p2267_p7 }
 0x428   : > { %1889 = dma.done.wait (!%p1594_p8), %s1308_s21, 384  }
 0x429   : > { %1891 = vsyncadd (!%p1594_p8), %s1308_s21, 4294966912  ;;  %s2268_s12 = sld [smem:[#allocation13_spill]]  ;;  %s2269_s20 = sld [smem:[#allocation12_spill]] }
 0x42a   : > { %s2270_s11 = sld [smem:[#allocation14_spill]]  ;;  %s2271_s30 = smov %s1898_s10 }
 0x42f   : > { %p21_p11 = scmp.ge.s32.totalorder %s2268_s12, 4   ;;  %s2272_s10 = smov %s2269_s20 }
 0x431   :  { %23 = sbr.rel (!%p21_p11) target bundleno = 7 (0x7), region = 104 }
 0x438   :  { %1313 = vsyncpa [#allocation3], 1 }
 0x439   :  { %1315 = vsyncpa [#allocation3 + $0x1], 1 }
 0x43a   :  { %1316 = vsyncpa [#allocation6], 1 }
 0x43b   :  { %1317 = vsyncpa [#allocation4], 1 }
 0x43c   :  { %1319 = vsyncpa [#allocation4 + $0x1], 1 }

</bundles_post_ra>
